<compile_context>
chip_gen: v5e
topology: v5e:2x2
jax: 0.10.0
libtpu: 0.0.40
codegen_flags: <defaults>
</compile_context>

<pallas_src>
import jax
import jax.numpy as jnp
from jax import lax
from jax.experimental import pallas as pl
from jax.experimental.pallas import tpu as pltpu

HIDDEN = 256
EPS_BN = 1e-5
EPS_L2 = 1e-12
_LANE = 128
_BF16_SUBLANE = 16


def _round_up(x, m):
    return (x + m - 1) // m * m


def _vmem_budget_bytes():
    """~75% of per-core VMEM (generation aware); conservative 64 MiB fallback."""
    cap = None
    try:
        info = pltpu.get_tpu_info()
        cap = getattr(info, "vmem_capacity_bytes", None)
    except Exception:
        cap = None
    if not cap:
        cap = 64 * 1024 * 1024      # v7x per-TC (smallest current generation)
    return int(cap) * 3 // 4


def _choose_k_layout(d_in, budget):
    """Return (K_pad, TK).  Keep w1 fully VMEM-resident when it fits."""
    k128 = _round_up(max(d_in, _LANE), _LANE)
    w1_vmem = k128 * HIDDEN * 2 * 2           # bf16, double-buffered
    if w1_vmem <= int(0.35 * budget):
        return k128, k128                      # single K block -> w1 DMA'd once
    tk = 8192
    return _round_up(d_in, tk), tk


def _embedder_kernel(x_ref, w1_ref, b1_ref, w2_ref, b2_ref, wo_ref, bo_ref,
                     out_ref, acc_ref):
    k = pl.program_id(1)

    @pl.when(k == 0)
    def _init():
        acc_ref[...] = jnp.zeros_like(acc_ref)

    # fc1 (bias=False); BN1 scale folded into w1 columns.  Activations arrive
    # in f32 (single HBM read) and are cast to bf16 on the VPU right before
    # the MXU; accumulation stays in f32.
    acc_ref[...] += jnp.dot(x_ref[...].astype(jnp.bfloat16), w1_ref[...],
                            preferred_element_type=jnp.float32)

    @pl.when(k == pl.num_programs(1) - 1)
    def _finish():
        # BN1 shift + ReLU.  Dropout(p=0.5) is identity in eval mode.
        h = jnp.maximum(acc_ref[...] + b1_ref[...], 0.0)

        # fc2 (bias=False) + folded BN2 shift + ReLU.
        h = jnp.dot(h.astype(jnp.bfloat16), w2_ref[...],
                    preferred_element_type=jnp.float32)
        h = jnp.maximum(h + b2_ref[...], 0.0)

        # fc_out (with bias).  Output columns are zero-padded to a lane
        # multiple at param-prep time, so the L2 norm below is unaffected.
        o = jnp.dot(h.astype(jnp.bfloat16), wo_ref[...],
                    preferred_element_type=jnp.float32) + bo_ref[...]

        # F.normalize(p=2, dim=1, eps=1e-12):  o / max(||o||, eps)
        sum_sq = jnp.sum(o * o, axis=-1, keepdims=True)
        inv = lax.rsqrt(jnp.maximum(sum_sq, EPS_L2 * EPS_L2))
        out_ref[...] = (o * inv).astype(out_ref.dtype)


def lfw_embedder_forward(x_img, kparams):
    """x_img: [B, C, H, W] float32 (NCHW).  Returns [B, out_dims] float32."""
    w1, b1 = kparams["w1"], kparams["b1"]
    w2, b2 = kparams["w2"], kparams["b2"]
    wo, bo = kparams["wo"], kparams["bo"]
    d_in, out_dims = kparams["d_in"], kparams["out_dims"]

    B = x_img.shape[0]
    # TODO(synk): backbone stand-in = flatten NCHW -> [B, C*H*W]
    feats = x_img.reshape(B, -1).astype(jnp.float32)
    assert feats.shape[1] == d_in

    budget = _vmem_budget_bytes()
    K_pad, TK = _choose_k_layout(d_in, budget)
    assert K_pad == w1.shape[0] and K_pad % TK == 0
    nk = K_pad // TK
    d_out_pad = wo.shape[1]

    # VMEM footprint model (bytes) used to size the batch tile.
    fixed = (TK * HIDDEN * 2 * 2                 # w1 tile (bf16, 2 bufs)
             + HIDDEN * HIDDEN * 2 * 2           # w2
             + HIDDEN * d_out_pad * 2 * 2        # wo
             + (2 * HIDDEN + d_out_pad) * 4 * 2)  # BN shifts + bias
    per_row = TK * 4 * 2 + HIDDEN * 4 + d_out_pad * 4 * 2   # feats + acc + out
    avail = max(budget - fixed, per_row * _BF16_SUBLANE)
    tb_cap = max(_BF16_SUBLANE,
                 min(512, (avail // per_row) // _BF16_SUBLANE * _BF16_SUBLANE))

    # Batch tile: multiple of 16 (bf16 sublane packing); at most half the
    # (padded) batch so the "parallel" b axis has >=2 blocks when possible
    # (keeps both v7x TensorCores busy).
    B16 = _round_up(B, _BF16_SUBLANE)
    TB = min(tb_cap,
             max(_BF16_SUBLANE, (B16 // 2) // _BF16_SUBLANE * _BF16_SUBLANE))
    B_pad = _round_up(B, TB)
    nb = B_pad // TB

    if B_pad != B or K_pad != d_in:
        feats = jnp.pad(feats, ((0, B_pad - B), (0, K_pad - d_in)))

    footprint = fixed + TB * per_row
    vmem_limit = int(max(min(budget, max(footprint * 3 // 2, 16 << 20)),
                         footprint + (2 << 20)))

    cost = pl.CostEstimate(
        flops=2 * B_pad * (K_pad * HIDDEN + HIDDEN * HIDDEN + HIDDEN * d_out_pad),
        transcendentals=B_pad,
        bytes_accessed=(B_pad * K_pad * 4
                        + K_pad * HIDDEN * 2 * (1 if nk == 1 else nb)
                        + HIDDEN * HIDDEN * 2
                        + HIDDEN * d_out_pad * 2
                        + (2 * HIDDEN + d_out_pad) * 4
                        + B_pad * d_out_pad * 4))

    out = pl.pallas_call(
        _embedder_kernel,
        out_shape=jax.ShapeDtypeStruct((B_pad, d_out_pad), jnp.float32),
        grid_spec=pltpu.PrefetchScalarGridSpec(
            num_scalar_prefetch=0,
            grid=(nb, nk),
            in_specs=[
                pl.BlockSpec((TB, TK), lambda b, k: (b, k)),              # feats (f32)
                pl.BlockSpec((TK, HIDDEN), lambda b, k: (k, 0)),          # w1 (BN folded)
                pl.BlockSpec((1, HIDDEN), lambda b, k: (0, 0)),           # bn1 shift
                pl.BlockSpec((HIDDEN, HIDDEN), lambda b, k: (0, 0)),      # w2 (BN folded)
                pl.BlockSpec((1, HIDDEN), lambda b, k: (0, 0)),           # bn2 shift
                pl.BlockSpec((HIDDEN, d_out_pad), lambda b, k: (0, 0)),   # wo
                pl.BlockSpec((1, d_out_pad), lambda b, k: (0, 0)),        # bo
            ],
            out_specs=pl.BlockSpec((TB, d_out_pad), lambda b, k: (b, 0)),
            scratch_shapes=[pltpu.VMEM((TB, HIDDEN), jnp.float32)]),
        compiler_params=pltpu.CompilerParams(
            dimension_semantics=("parallel", "arbitrary"),
            vmem_limit_bytes=vmem_limit),
        cost_estimate=cost,
    )(feats, w1, b1, w2, b2, wo, bo)
    return out[:B, :out_dims]


def make_raw_params(key, input_dims, out_dims):
    """Raw (PyTorch-equivalent) parameters; weights stored as [in, out]."""
    ks = jax.random.split(key, 12)
    w1 = jax.random.normal(ks[0], (input_dims, HIDDEN), jnp.float32) * 0.02
    w2 = jax.random.normal(ks[1], (HIDDEN, HIDDEN), jnp.float32) * 0.05
    wo = jax.random.normal(ks[2], (HIDDEN, out_dims), jnp.float32) * 0.05
    bo = jax.random.normal(ks[3], (out_dims,), jnp.float32) * 0.01
    g1 = 1.0 + 0.1 * jax.random.normal(ks[4], (HIDDEN,), jnp.float32)
    be1 = 0.1 * jax.random.normal(ks[5], (HIDDEN,), jnp.float32)
    rm1 = 0.1 * jax.random.normal(ks[6], (HIDDEN,), jnp.float32)
    rv1 = 1.0 + 0.1 * jnp.abs(jax.random.normal(ks[7], (HIDDEN,), jnp.float32))
    g2 = 1.0 + 0.1 * jax.random.normal(ks[8], (HIDDEN,), jnp.float32)
    be2 = 0.1 * jax.random.normal(ks[9], (HIDDEN,), jnp.float32)
    rm2 = 0.1 * jax.random.normal(ks[10], (HIDDEN,), jnp.float32)
    rv2 = 1.0 + 0.1 * jnp.abs(jax.random.normal(ks[11], (HIDDEN,), jnp.float32))
    return dict(w1=w1, g1=g1, be1=be1, rm1=rm1, rv1=rv1,
                w2=w2, g2=g2, be2=be2, rm2=rm2, rv2=rv2, wo=wo, bo=bo)


def prepare_kernel_params(raw, input_dims, out_dims):
    """Fold BatchNorm (running stats, affine) into weights, cast to bf16, and
    do ALL shape padding once (K pad of w1, lane pad of wo/bo).

      scale = gamma / sqrt(running_var + eps)
      w'    = w * scale        (per output column)
      shift = beta - running_mean * scale
    """
    s1 = raw["g1"] / jnp.sqrt(raw["rv1"] + EPS_BN)
    b1 = (raw["be1"] - raw["rm1"] * s1).reshape(1, HIDDEN).astype(jnp.float32)
    s2 = raw["g2"] / jnp.sqrt(raw["rv2"] + EPS_BN)
    b2 = (raw["be2"] - raw["rm2"] * s2).reshape(1, HIDDEN).astype(jnp.float32)

    # TODO(synk): folding the BN scale into bf16 w1 can amplify quantization
    # error for columns with extreme gamma/sqrt(var); keep w1 in f32 if needed.
    w1 = (raw["w1"] * s1[None, :]).astype(jnp.bfloat16)
    w2 = (raw["w2"] * s2[None, :]).astype(jnp.bfloat16)
    wo = raw["wo"].astype(jnp.bfloat16)
    bo = raw["bo"].reshape(1, -1).astype(jnp.float32)

    # One-time padding (not per forward call).
    K_pad, _ = _choose_k_layout(input_dims, _vmem_budget_bytes())
    if K_pad != input_dims:
        w1 = jnp.pad(w1, ((0, K_pad - input_dims), (0, 0)))
    d_out_pad = _round_up(out_dims, _LANE)
    if d_out_pad != out_dims:
        wo = jnp.pad(wo, ((0, 0), (0, d_out_pad - out_dims)))
        bo = jnp.pad(bo, ((0, 0), (0, d_out_pad - out_dims)))

    return dict(w1=w1, b1=b1, w2=w2, b2=b2, wo=wo, bo=bo,
                d_in=input_dims, out_dims=out_dims)


def reference_forward_f32(x_img, raw):
    """Pure-JAX f32 reference of the eval-mode PyTorch forward."""
    B = x_img.shape[0]
    x = x_img.reshape(B, -1).astype(jnp.float32)
    h = x @ raw["w1"]
    h = (h - raw["rm1"]) / jnp.sqrt(raw["rv1"] + EPS_BN) * raw["g1"] + raw["be1"]
    h = jnp.maximum(h, 0.0)
    h = h @ raw["w2"]
    h = (h - raw["rm2"]) / jnp.sqrt(raw["rv2"] + EPS_BN) * raw["g2"] + raw["be2"]
    h = jnp.maximum(h, 0.0)
    o = h @ raw["wo"] + raw["bo"]
    n = jnp.sqrt(jnp.sum(o * o, axis=-1, keepdims=True))
    return o / jnp.maximum(n, EPS_L2)


def reference_forward_bf16(x_img, kp):
    """Pure-JAX reference mirroring the kernel's bf16-input / f32-acc math."""
    d_in, out_dims = kp["d_in"], kp["out_dims"]
    B = x_img.shape[0]
    x = x_img.reshape(B, -1).astype(jnp.float32).astype(jnp.bfloat16)
    h = jnp.dot(x, kp["w1"][:d_in], preferred_element_type=jnp.float32) + kp["b1"]
    h = jnp.maximum(h, 0.0)
    h = jnp.dot(h.astype(jnp.bfloat16), kp["w2"],
                preferred_element_type=jnp.float32) + kp["b2"]
    h = jnp.maximum(h, 0.0)
    o = jnp.dot(h.astype(jnp.bfloat16), kp["wo"],
                preferred_element_type=jnp.float32) + kp["bo"]
    o = o[:, :out_dims]
    sum_sq = jnp.sum(o * o, axis=-1, keepdims=True)
    return o * lax.rsqrt(jnp.maximum(sum_sq, EPS_L2 * EPS_L2))


if __name__ == "__main__":
    B, C, H, W = 2, 4, 16, 16          # NCHW image input
    input_dims = C * H * W             # 1024 (backbone stand-in = flatten)
    out_dims = 128

    key = jax.random.PRNGKey(0)
    kx, kp = jax.random.split(key)
    x_img = jax.random.normal(kx, (B, C, H, W), jnp.float32)

    raw = make_raw_params(kp, input_dims, out_dims)
    kparams = prepare_kernel_params(raw, input_dims, out_dims)

    out = lfw_embedder_forward(x_img, kparams)
    out = jax.block_until_ready(out)
    assert out.shape == (B, out_dims)

    # Tight check vs a reference that mirrors the kernel's bf16/f32-acc math.
    ref_bf16 = reference_forward_bf16(x_img, kparams)
    assert jnp.allclose(out, ref_bf16, rtol=1e-3, atol=1e-3), \
        "mismatch vs bf16 reference"

    # Loose check vs the full-f32 eval-mode module semantics.
    ref_f32 = reference_forward_f32(x_img, raw)
    assert jnp.allclose(out, ref_f32, rtol=5e-2, atol=5e-2), \
        "mismatch vs f32 reference"

    # Embeddings must be unit-norm.
    assert jnp.allclose(jnp.linalg.norm(out, axis=-1), 1.0, atol=1e-3)

    print("KERNEL_OK")
</pallas_src>

<mosaic_0001>
module attributes {stable_mosaic.version = 11 : i64} {
  func.func @_embedder_kernel(%arg0: i32, %arg1: i32, %arg2: memref<16x1024xf32, #tpu.memory_space<vmem>>, %arg3: memref<1024x256xbf16, #tpu.memory_space<vmem>>, %arg4: memref<1x256xf32, #tpu.memory_space<vmem>>, %arg5: memref<256x256xbf16, #tpu.memory_space<vmem>>, %arg6: memref<1x256xf32, #tpu.memory_space<vmem>>, %arg7: memref<256x128xbf16, #tpu.memory_space<vmem>>, %arg8: memref<1x128xf32, #tpu.memory_space<vmem>>, %arg9: memref<16x128xf32, #tpu.memory_space<vmem>>, %arg10: memref<16x256xf32, #tpu.memory_space<vmem>>) attributes {dimension_semantics = [#tpu.dimension_semantics<parallel>, #tpu.dimension_semantics<arbitrary>], iteration_bounds = array<i64: 1, 1>, scalar_prefetch = 0 : i64, scratch_operands = 1 : i64, tpu.core_type = #tpu.core_type<tc>, window_params = [{transform_indices = @transform_0, window_bounds = array<i64: 16, 1024>}, {transform_indices = @transform_1, window_bounds = array<i64: 1024, 256>}, {pipeline_mode = #tpu.pipeline_mode<synchronous>, transform_indices = @transform_2, window_bounds = array<i64: 1, 256>}, {pipeline_mode = #tpu.pipeline_mode<synchronous>, transform_indices = @transform_3, window_bounds = array<i64: 256, 256>}, {pipeline_mode = #tpu.pipeline_mode<synchronous>, transform_indices = @transform_4, window_bounds = array<i64: 1, 256>}, {pipeline_mode = #tpu.pipeline_mode<synchronous>, transform_indices = @transform_5, window_bounds = array<i64: 256, 128>}, {pipeline_mode = #tpu.pipeline_mode<synchronous>, transform_indices = @transform_6, window_bounds = array<i64: 1, 128>}, {transform_indices = @transform_7, window_bounds = array<i64: 16, 128>}]} {
    %c0_i32 = arith.constant 0 : i32
    %0 = arith.cmpi eq, %arg1, %c0_i32 : i32
    %1 = arith.extui %0 : i1 to i32
    %c0_i32_0 = arith.constant 0 : i32
    %2 = arith.cmpi ne, %1, %c0_i32_0 : i32
    scf.if %2 {
      %cst_10 = arith.constant 0.000000e+00 : f32
      %13 = vector.broadcast %cst_10 : f32 to vector<16x256xf32>
      %c0_11 = arith.constant 0 : index
      %c0_12 = arith.constant 0 : index
      %14 = vector.load %arg10[%c0_11, %c0_12] : memref<16x256xf32, #tpu.memory_space<vmem>>, vector<16x256xf32>
      tpu.vector_store %arg10[%c0_11, %c0_12], %13 {strides = array<i32>} : memref<16x256xf32, #tpu.memory_space<vmem>>, vector<16x256xf32>,
    } else {
    }
    %c0 = arith.constant 0 : index
    %c0_1 = arith.constant 0 : index
    %3 = vector.load %arg10[%c0, %c0_1] : memref<16x256xf32, #tpu.memory_space<vmem>>, vector<16x256xf32>
    %c0_2 = arith.constant 0 : index
    %c0_3 = arith.constant 0 : index
    %4 = vector.load %arg2[%c0_2, %c0_3] : memref<16x1024xf32, #tpu.memory_space<vmem>>, vector<16x1024xf32>
    %5 = arith.truncf %4 : vector<16x1024xf32> to vector<16x1024xbf16>
    %c0_4 = arith.constant 0 : index
    %c0_5 = arith.constant 0 : index
    %6 = vector.load %arg3[%c0_4, %c0_5] : memref<1024x256xbf16, #tpu.memory_space<vmem>>, vector<1024x256xbf16>
    %cst = arith.constant dense<0.000000e+00> : vector<16x256xf32>
    %7 = tpu.matmul %5, %6, %cst {dimension_numbers = #tpu.dot_dimension_numbers<[1], [0], [0], [1], [0, 0, 1, 1], [], []>} : vector<16x1024xbf16>, vector<1024x256xbf16>, vector<16x256xf32> -> vector<16x256xf32>
    %8 = arith.addf %3, %7 : vector<16x256xf32>
    %c0_6 = arith.constant 0 : index
    %c0_7 = arith.constant 0 : index
    %9 = vector.load %arg10[%c0_6, %c0_7] : memref<16x256xf32, #tpu.memory_space<vmem>>, vector<16x256xf32>
    tpu.vector_store %arg10[%c0_6, %c0_7], %8 {strides = array<i32>} : memref<16x256xf32, #tpu.memory_space<vmem>>, vector<16x256xf32>,
    %c0_i32_8 = arith.constant 0 : i32
    %10 = arith.cmpi eq, %arg1, %c0_i32_8 : i32
    %11 = arith.extui %10 : i1 to i32
    %c0_i32_9 = arith.constant 0 : i32
    %12 = arith.cmpi ne, %11, %c0_i32_9 : i32
    scf.if %12 {
      %c0_10 = arith.constant 0 : index
      %c0_11 = arith.constant 0 : index
      %13 = vector.load %arg10[%c0_10, %c0_11] : memref<16x256xf32, #tpu.memory_space<vmem>>, vector<16x256xf32>
      %c0_12 = arith.constant 0 : index
      %c0_13 = arith.constant 0 : index
      %14 = vector.load %arg4[%c0_12, %c0_13] : memref<1x256xf32, #tpu.memory_space<vmem>>, vector<1x256xf32>
      %15 = vector.broadcast %14 : vector<1x256xf32> to vector<16x256xf32>
      %16 = arith.addf %13, %15 : vector<16x256xf32>
      %cst_14 = arith.constant 0.000000e+00 : f32
      %17 = vector.broadcast %cst_14 : f32 to vector<16x256xf32>
      %18 = arith.maximumf %16, %17 : vector<16x256xf32>
      %19 = arith.truncf %18 : vector<16x256xf32> to vector<16x256xbf16>
      %c0_15 = arith.constant 0 : index
      %c0_16 = arith.constant 0 : index
      %20 = vector.load %arg5[%c0_15, %c0_16] : memref<256x256xbf16, #tpu.memory_space<vmem>>, vector<256x256xbf16>
      %cst_17 = arith.constant dense<0.000000e+00> : vector<16x256xf32>
      %21 = tpu.matmul %19, %20, %cst_17 {dimension_numbers = #tpu.dot_dimension_numbers<[1], [0], [0], [1], [0, 0, 1, 1], [], []>} : vector<16x256xbf16>, vector<256x256xbf16>, vector<16x256xf32> -> vector<16x256xf32>
      %c0_18 = arith.constant 0 : index
      %c0_19 = arith.constant 0 : index
      %22 = vector.load %arg6[%c0_18, %c0_19] : memref<1x256xf32, #tpu.memory_space<vmem>>, vector<1x256xf32>
      %23 = vector.broadcast %22 : vector<1x256xf32> to vector<16x256xf32>
      %24 = arith.addf %21, %23 : vector<16x256xf32>
      %cst_20 = arith.constant 0.000000e+00 : f32
      %25 = vector.broadcast %cst_20 : f32 to vector<16x256xf32>
      %26 = arith.maximumf %24, %25 : vector<16x256xf32>
      %27 = arith.truncf %26 : vector<16x256xf32> to vector<16x256xbf16>
      %c0_21 = arith.constant 0 : index
      %c0_22 = arith.constant 0 : index
      %28 = vector.load %arg7[%c0_21, %c0_22] : memref<256x128xbf16, #tpu.memory_space<vmem>>, vector<256x128xbf16>
      %cst_23 = arith.constant dense<0.000000e+00> : vector<16x128xf32>
      %29 = tpu.matmul %27, %28, %cst_23 {dimension_numbers = #tpu.dot_dimension_numbers<[1], [0], [0], [1], [0, 0, 1, 1], [], []>} : vector<16x256xbf16>, vector<256x128xbf16>, vector<16x128xf32> -> vector<16x128xf32>
      %c0_24 = arith.constant 0 : index
      %c0_25 = arith.constant 0 : index
      %30 = vector.load %arg8[%c0_24, %c0_25] : memref<1x128xf32, #tpu.memory_space<vmem>>, vector<1x128xf32>
      %31 = vector.broadcast %30 : vector<1x128xf32> to vector<16x128xf32>
      %32 = arith.addf %29, %31 : vector<16x128xf32>
      %33 = arith.mulf %32, %32 : vector<16x128xf32>
      %cst_26 = arith.constant dense<0.000000e+00> : vector<16xf32>
      %34 = vector.multi_reduction <add>, %33, %cst_26 [1] : vector<16x128xf32> to vector<16xf32>
      %35 = vector.shape_cast %34 : vector<16xf32> to vector<16x1xf32>
      %cst_27 = arith.constant 1.000000e-24 : f32
      %36 = vector.broadcast %cst_27 : f32 to vector<16x1xf32>
      %37 = arith.maximumf %35, %36 : vector<16x1xf32>
      %38 = math.rsqrt %37 : vector<16x1xf32>
      %39 = vector.broadcast %38 : vector<16x1xf32> to vector<16x128xf32>
      %40 = arith.mulf %32, %39 : vector<16x128xf32>
      %c0_28 = arith.constant 0 : index
      %c0_29 = arith.constant 0 : index
      %41 = vector.load %arg9[%c0_28, %c0_29] : memref<16x128xf32, #tpu.memory_space<vmem>>, vector<16x128xf32>
      tpu.vector_store %arg9[%c0_28, %c0_29], %40 {strides = array<i32>} : memref<16x128xf32, #tpu.memory_space<vmem>>, vector<16x128xf32>,
    } else {
    }
    return
  }
  func.func @transform_0(%arg0: i32, %arg1: i32) -> (i32, i32) {
    %c0_i32 = arith.constant 0 : i32
    return %arg0, %arg1 : i32, i32
  }
  func.func @transform_1(%arg0: i32, %arg1: i32) -> (i32, i32) {
    %c0_i32 = arith.constant 0 : i32
    %c0_i32_0 = arith.constant 0 : i32
    return %arg1, %c0_i32 : i32, i32
  }
  func.func @transform_2(%arg0: i32, %arg1: i32) -> (i32, i32) {
    %c0_i32 = arith.constant 0 : i32
    %c0_i32_0 = arith.constant 0 : i32
    %c0_i32_1 = arith.constant 0 : i32
    return %c0_i32, %c0_i32_0 : i32, i32
  }
  func.func @transform_3(%arg0: i32, %arg1: i32) -> (i32, i32) {
    %c0_i32 = arith.constant 0 : i32
    %c0_i32_0 = arith.constant 0 : i32
    %c0_i32_1 = arith.constant 0 : i32
    return %c0_i32, %c0_i32_0 : i32, i32
  }
  func.func @transform_4(%arg0: i32, %arg1: i32) -> (i32, i32) {
    %c0_i32 = arith.constant 0 : i32
    %c0_i32_0 = arith.constant 0 : i32
    %c0_i32_1 = arith.constant 0 : i32
    return %c0_i32, %c0_i32_0 : i32, i32
  }
  func.func @transform_5(%arg0: i32, %arg1: i32) -> (i32, i32) {
    %c0_i32 = arith.constant 0 : i32
    %c0_i32_0 = arith.constant 0 : i32
    %c0_i32_1 = arith.constant 0 : i32
    return %c0_i32, %c0_i32_0 : i32, i32
  }
  func.func @transform_6(%arg0: i32, %arg1: i32) -> (i32, i32) {
    %c0_i32 = arith.constant 0 : i32
    %c0_i32_0 = arith.constant 0 : i32
    %c0_i32_1 = arith.constant 0 : i32
    return %c0_i32, %c0_i32_0 : i32, i32
  }
  func.func @transform_7(%arg0: i32, %arg1: i32) -> (i32, i32) {
    %c0_i32 = arith.constant 0 : i32
    %c0_i32_0 = arith.constant 0 : i32
    return %arg0, %c0_i32 : i32, i32
  }
}

</mosaic_0001>

<bundles_post_ra>
// kernel: tpu_custom_call.1
= control target key start
LH: loop header
LB: loop body
LE: loop exit
PB: predicated region body
PF: predicated region fallthrough
CT: control target
= control target key end

     0   :  { %12 = vsyncpa [#allocation4], 0  ;;  %s2803_s0 = inlined_call_operand.hbm [shape: f32[16,1024], index: 0, kind: input, shape index: {}]   ;;  %s2804_s1 = inlined_call_operand.hbm [shape: bf16[1024,256], index: 1, kind: input, shape index: {}]   ;;  %s2805_s2 = inlined_call_operand.hbm [shape: f32[1,256], index: 2, kind: input, shape index: {}]   ;;  %s2806_s3 = inlined_call_operand.hbm [shape: bf16[256,256], index: 3, kind: input, shape index: {}]   ;;  %s2807_s4 = inlined_call_operand.vmem [shape: f32[1,256], index: 4, kind: input, shape index: {}]   ;;  %s2808_s5 = inlined_call_operand.hbm [shape: bf16[256,128], index: 5, kind: input, shape index: {}]   ;;  %s2809_s6 = inlined_call_operand.vmem [shape: f32[1,128], index: 6, kind: input, shape index: {}]   ;;  %s2810_s7 = inlined_call_operand.hbm [shape: f32[16,128], index: 7, kind: output, shape index: {}]  }
   0x1   :  { %13 = vsyncpa [#allocation7], 0 }
   0x2   :  { %14 = vsyncpa [#allocation10], 0  ;;  %s33_s26 = sshll.u32 %s2804_s1, 4  ;;  %s34_s26 = int_to_ptr.hbm [resolvable:$true] %s33_s26 }
   0x3   :  { %15 = vsyncpa [#allocation5], 0  ;;  %s2683_s27 = smov [#allocation6]   ;;  %s57_s8 = sshll.u32 %s2806_s3, 4  ;;  %s58_s8 = int_to_ptr.hbm [resolvable:$true] %s57_s8 }
   0x4   :  { %s35_s28 = sshll.u32 %s2683_s27, 4  ;;  %s2684_s9 = smov 128   ;;  %s36_s28 = int_to_ptr.vmem [resolvable:$true] %s35_s28 }
   0x5   :  { %s2685_s10 = smov 8   ;;  %s2686_s11 = smov [#allocation9]  }
   0x6   :  { %41 = dma.hbm_to_vmem [thread:$0]  %s34_s26, 16384, %s36_s28, [#allocation7], %s2684_s9, %s2684_s9, %s2685_s10  }
   0x7   :  { %s59_s12 = sshll.u32 %s2686_s11, 4  ;;  %s20_s14 = sshll.u32 %s2803_s0, 4  ;;  %s60_s12 = int_to_ptr.vmem [resolvable:$true] %s59_s12  ;;  %s21_s14 = int_to_ptr.hbm [resolvable:$true] %s20_s14 }
   0x8   :  { %65 = dma.hbm_to_vmem [thread:$0]  %s58_s8, 4096, %s60_s12, [#allocation10], %s2684_s9, %s2684_s9, %s2685_s10  }
   0x9   :  { %s2687_s3 = smov [#allocation3]   ;;  %s47_s18 = sshll.u32 %s2805_s2, 4  ;;  %s48_s18 = int_to_ptr.hbm [resolvable:$true] %s47_s18 }
   0xa   :  { %s22_s15 = sshll.u32 %s2687_s3, 4  ;;  %s2688_s19 = smov 1024   ;;  %s23_s15 = int_to_ptr.vmem [resolvable:$true] %s22_s15 }
   0xb   :  { %s2689_s20 = smov 64   ;;  %s2690_s21 = smov [#allocation8]  }
   0xc   :  { %28 = dma.hbm_to_vmem [thread:$0]  %s21_s14, 2048, %s23_s15, [#allocation4], %s2688_s19, %s2688_s19, %s2689_s20  }
   0xd   :  { %s49_s22 = sshll.u32 %s2690_s21, 4  ;;  %s72_s24 = sshll.u32 %s2808_s5, 4  ;;  %s50_s22 = int_to_ptr.vmem [resolvable:$true] %s49_s22  ;;  %s73_s24 = int_to_ptr.hbm [resolvable:$true] %s72_s24 }
   0xe   :  { %52 = dma.hbm_to_vmem [thread:$0]  %s48_s18, 32, %s50_s22, [#allocation7]  }
   0xf   :  { %s2691_s25 = smov [#allocation11]   ;;  %s2692_s27 = smov 4  }
  0x10   :  { %s74_s26 = sshll.u32 %s2691_s25, 4  ;;  %s75_s26 = int_to_ptr.vmem [resolvable:$true] %s74_s26 }
  0x11   :  { %80 = dma.hbm_to_vmem [thread:$0]  %s73_s24, 2048, %s75_s26, [#allocation10], %s2689_s20, %s2689_s20, %s2692_s27  }
  0x12   :  { %2675 = dma.done.wait [#allocation4], 2048  }
  0x13   :  { %2676 = vsyncadd [#allocation4], 4294965248 }
  0x14   :  { %2677 = dma.done.wait [#allocation7], 16416  }
  0x15   :  { %2678 = vsyncadd [#allocation7], 4294950880 }
  0x16   :  { %2679 = dma.done.wait [#allocation10], 6144  }
  0x17   :  { %2680 = vsyncadd [#allocation10], 4294961152  ;;  %v1693_v0 = vld [vmem:[#allocation6 + $0x70] sm:$0xf]  ;;  %v2354_v1 = vld [vmem:[#allocation6 + $0x74] sm:$0xf0] }
  0x18   :  { %v1757_v2 = vld [vmem:[#allocation6 + $0xf0] sm:$0xf]  ;;  %v1694_v3 = vor.u32 %v2354_v1, %v1693_v0  ;;  %v2370_v4 = vld [vmem:[#allocation6 + $0xf4] sm:$0xf0]  ;;  %v1685_v11 = vld [vmem:[#allocation6 + $0x60] sm:$0xf] }
  0x19   :  { %v1821_v5 = vld [vmem:[#allocation6 + $0x170] sm:$0xf]  ;;  %v2386_v6 = vld [vmem:[#allocation6 + $0x174] sm:$0xf0]  ;;  %v1758_v7 = vor.u32 %v2370_v4, %v1757_v2  ;;  %v2352_v13 = vld [vmem:[#allocation6 + $0x64] sm:$0xf0] }
  0x1a   :  { %v1822_v8 = vor.u32 %v2386_v6, %v1821_v5  ;;  %v1885_v9 = vld [vmem:[#allocation6 + $0x1f0] sm:$0xf]  ;;  %v2402_v10 = vld [vmem:[#allocation6 + $0x1f4] sm:$0xf0]  ;;  %907 = vmatpush.bf16.msra.mxu0 %v1694_v3  ;;  %v1749_v14 = vld [vmem:[#allocation6 + $0xe0] sm:$0xf]  ;;  %v1686_v16 = vor.u32 %v2352_v13, %v1685_v11 }
  0x1b   :  { %v1886_v12 = vor.u32 %v2402_v10, %v1885_v9  ;;  %v2368_v15 = vld [vmem:[#allocation6 + $0xe4] sm:$0xf0]  ;;  %921 = vmatpush.bf16.msra.mxu1 %v1758_v7  ;;  %v1813_v18 = vld [vmem:[#allocation6 + $0x160] sm:$0xf]  ;;  %v1677_v23 = vld [vmem:[#allocation6 + $0x50] sm:$0xf] }
  0x1c   :  { %935 = vmatpush.bf16.msra.mxu2 %v1822_v8  ;;  %v1750_v17 = vor.u32 %v2368_v15, %v1749_v14  ;;  %v2384_v19 = vld [vmem:[#allocation6 + $0x164] sm:$0xf0]  ;;  %v1877_v20 = vld [vmem:[#allocation6 + $0x1e0] sm:$0xf]  ;;  %v2350_v24 = vld [vmem:[#allocation6 + $0x54] sm:$0xf0] }
  0x1d   :  { %949 = vmatpush.bf16.msra.mxu3 %v1886_v12  ;;  %v1814_v21 = vor.u32 %v2384_v19, %v1813_v18  ;;  %v2400_v22 = vld [vmem:[#allocation6 + $0x1e4] sm:$0xf0]  ;;  %v1741_v26 = vld [vmem:[#allocation6 + $0xd0] sm:$0xf]  ;;  %v2366_v27 = vld [vmem:[#allocation6 + $0xd4] sm:$0xf0]  ;;  %v1678_v29 = vor.u32 %v2350_v24, %v1677_v23 }
  0x1e   :  { %v1878_v25 = vor.u32 %v2400_v22, %v1877_v20  ;;  %v1805_v28 = vld [vmem:[#allocation6 + $0x150] sm:$0xf]  ;;  %908 = vmatpush.bf16.msra.mxu0 %v1686_v16  ;;  %v2382_v30 = vld [vmem:[#allocation6 + $0x154] sm:$0xf0]  ;;  %v1742_v33 = vor.u32 %v2366_v27, %v1741_v26  ;;  %v1669_v35 = vld [vmem:[#allocation6 + $0x40] sm:$0xf] }
  0x1f   :  { %v1869_v31 = vld [vmem:[#allocation6 + $0x1d0] sm:$0xf]  ;;  %v2398_v32 = vld [vmem:[#allocation6 + $0x1d4] sm:$0xf0]  ;;  %922 = vmatpush.bf16.msra.mxu1 %v1750_v17  ;;  %v1806_v34 = vor.u32 %v2382_v30, %v1805_v28  ;;  %v2348_v36 = vld [vmem:[#allocation6 + $0x44] sm:$0xf0] }
  0x20   :  { %936 = vmatpush.bf16.msra.mxu2 %v1814_v21  ;;  %v1733_v37 = vld [vmem:[#allocation6 + $0xc0] sm:$0xf]  ;;  %v1870_v38 = vor.u32 %v2398_v32, %v1869_v31  ;;  %v2364_v39 = vld [vmem:[#allocation6 + $0xc4] sm:$0xf0]  ;;  %v1670_v44 = vor.u32 %v2348_v36, %v1669_v35  ;;  %v1661_v47 = vld [vmem:[#allocation6 + $0x30] sm:$0xf] }
  0x21   :  { %950 = vmatpush.bf16.msra.mxu3 %v1878_v25  ;;  %v1797_v40 = vld [vmem:[#allocation6 + $0x140] sm:$0xf]  ;;  %v2380_v41 = vld [vmem:[#allocation6 + $0x144] sm:$0xf0]  ;;  %v1734_v45 = vor.u32 %v2364_v39, %v1733_v37  ;;  %v2346_v48 = vld [vmem:[#allocation6 + $0x34] sm:$0xf0] }
  0x22   :  { %v1861_v42 = vld [vmem:[#allocation6 + $0x1c0] sm:$0xf]  ;;  %v2396_v43 = vld [vmem:[#allocation6 + $0x1c4] sm:$0xf0]  ;;  %909 = vmatpush.bf16.msra.mxu0 %v1678_v29  ;;  %v1798_v46 = vor.u32 %v2380_v41, %v1797_v40  ;;  %v1725_v49 = vld [vmem:[#allocation6 + $0xb0] sm:$0xf]  ;;  %v1662_v56 = vor.u32 %v2346_v48, %v1661_v47 }
  0x23   :  { %923 = vmatpush.bf16.msra.mxu1 %v1742_v33  ;;  %v1862_v50 = vor.u32 %v2396_v43, %v1861_v42  ;;  %v2362_v51 = vld [vmem:[#allocation6 + $0xb4] sm:$0xf0]  ;;  %v1789_v52 = vld [vmem:[#allocation6 + $0x130] sm:$0xf]  ;;  %v1653_v59 = vld [vmem:[#allocation6 + $0x20] sm:$0xf] }
  0x24   :  { %937 = vmatpush.bf16.msra.mxu2 %v1806_v34  ;;  %v2378_v53 = vld [vmem:[#allocation6 + $0x134] sm:$0xf0]  ;;  %v1853_v54 = vld [vmem:[#allocation6 + $0x1b0] sm:$0xf]  ;;  %v1726_v57 = vor.u32 %v2362_v51, %v1725_v49  ;;  %v2344_v60 = vld [vmem:[#allocation6 + $0x24] sm:$0xf0] }
  0x25   :  { %951 = vmatpush.bf16.msra.mxu3 %v1870_v38  ;;  %v2394_v55 = vld [vmem:[#allocation6 + $0x1b4] sm:$0xf0]  ;;  %v1790_v58 = vor.u32 %v2378_v53, %v1789_v52  ;;  %v1717_v61 = vld [vmem:[#allocation6 + $0xa0] sm:$0xf]  ;;  %v2360_v63 = vld [vmem:[#allocation6 + $0xa4] sm:$0xf0]  ;;  %v1654_v4 = vor.u32 %v2344_v60, %v1653_v59 }
  0x26   :  { %910 = vmatpush.bf16.msra.mxu0 %v1670_v44  ;;  %v1854_v62 = vor.u32 %v2394_v55, %v1853_v54  ;;  %v1781_v0 = vld [vmem:[#allocation6 + $0x120] sm:$0xf]  ;;  %v2376_v1 = vld [vmem:[#allocation6 + $0x124] sm:$0xf0]  ;;  %v1718_v5 = vor.u32 %v2360_v63, %v1717_v61  ;;  %v1645_v7 = vld [vmem:[#allocation6 + $0x10] sm:$0xf] }
  0x27   :  { %924 = vmatpush.bf16.msra.mxu1 %v1734_v45  ;;  %v1845_v2 = vld [vmem:[#allocation6 + $0x1a0] sm:$0xf]  ;;  %v2392_v3 = vld [vmem:[#allocation6 + $0x1a4] sm:$0xf0]  ;;  %v1782_v6 = vor.u32 %v2376_v1, %v1781_v0  ;;  %v2342_v8 = vld [vmem:[#allocation6 + $0x14] sm:$0xf0] }
  0x28   :  { %938 = vmatpush.bf16.msra.mxu2 %v1798_v46  ;;  %v1709_v9 = vld [vmem:[#allocation6 + $0x90] sm:$0xf]  ;;  %v1846_v10 = vor.u32 %v2392_v3, %v1845_v2  ;;  %v2358_v11 = vld [vmem:[#allocation6 + $0x94] sm:$0xf0]  ;;  %v1646_v16 = vor.u32 %v2342_v8, %v1645_v7  ;;  %v1637_v17 = vld [vmem:[#allocation6] sm:$0xf] }
  0x29   :  { %952 = vmatpush.bf16.msra.mxu3 %v1862_v50  ;;  %v1773_v12 = vld [vmem:[#allocation6 + $0x110] sm:$0xf]  ;;  %v2374_v13 = vld [vmem:[#allocation6 + $0x114] sm:$0xf0]  ;;  %v2340_v18 = vld [vmem:[#allocation6 + $0x4] sm:$0xf0]  ;;  %v1710_v19 = vor.u32 %v2358_v11, %v1709_v9 }
  0x2a   :  { %911 = vmatpush.bf16.msra.mxu0 %v1662_v56  ;;  %v1837_v14 = vld [vmem:[#allocation6 + $0x190] sm:$0xf]  ;;  %v2390_v15 = vld [vmem:[#allocation6 + $0x194] sm:$0xf0]  ;;  %v1774_v20 = vor.u32 %v2374_v13, %v1773_v12  ;;  %v1701_v21 = vld [vmem:[#allocation6 + $0x80] sm:$0xf]  ;;  %v1638_v31 = vor.u32 %v2340_v18, %v1637_v17 }
  0x2b   :  { %925 = vmatpush.bf16.msra.mxu1 %v1726_v57  ;;  %v2356_v22 = vld [vmem:[#allocation6 + $0x84] sm:$0xf0]  ;;  %v1765_v23 = vld [vmem:[#allocation6 + $0x100] sm:$0xf]  ;;  %v1838_v24 = vor.u32 %v2390_v15, %v1837_v14  ;;  %v1949_v28 = vld [vmem:[#allocation6 + $0x270] sm:$0xf] }
  0x2c   :  { %939 = vmatpush.bf16.msra.mxu2 %v1790_v58  ;;  %v2372_v25 = vld [vmem:[#allocation6 + $0x104] sm:$0xf0]  ;;  %v1829_v26 = vld [vmem:[#allocation6 + $0x180] sm:$0xf]  ;;  %v2418_v29 = vld [vmem:[#allocation6 + $0x274] sm:$0xf0]  ;;  %v1702_v35 = vor.u32 %v2356_v22, %v1701_v21 }
  0x2d   :  { %953 = vmatpush.bf16.msra.mxu3 %v1854_v62  ;;  %v2388_v27 = vld [vmem:[#allocation6 + $0x184] sm:$0xf0]  ;;  %v2013_v30 = vld [vmem:[#allocation6 + $0x2f0] sm:$0xf]  ;;  %v2434_v32 = vld [vmem:[#allocation6 + $0x2f4] sm:$0xf0]  ;;  %v1766_v36 = vor.u32 %v2372_v25, %v1765_v23  ;;  %v1950_v40 = vor.u32 %v2418_v29, %v1949_v28 }
  0x2e   :  { %912 = vmatpush.bf16.msra.mxu0 %v1654_v4  ;;  %v2077_v33 = vld [vmem:[#allocation6 + $0x370] sm:$0xf]  ;;  %v2450_v34 = vld [vmem:[#allocation6 + $0x374] sm:$0xf0]  ;;  %v1830_v39 = vor.u32 %v2388_v27, %v1829_v26  ;;  %v1941_v41 = vld [vmem:[#allocation6 + $0x260] sm:$0xf]  ;;  %v2014_v43 = vor.u32 %v2434_v32, %v2013_v30 }
  0x2f   :  { %926 = vmatpush.bf16.msra.mxu1 %v1718_v5  ;;  %v2141_v37 = vld [vmem:[#allocation6 + $0x3f0] sm:$0xf]  ;;  %v2466_v38 = vld [vmem:[#allocation6 + $0x3f4] sm:$0xf0]  ;;  %v2416_v42 = vld [vmem:[#allocation6 + $0x264] sm:$0xf0]  ;;  %v2078_v44 = vor.u32 %v2450_v34, %v2077_v33 }
  0x30   :  { %940 = vmatpush.bf16.msra.mxu2 %v1782_v6  ;;  %v2005_v45 = vld [vmem:[#allocation6 + $0x2e0] sm:$0xf]  ;;  %v2432_v46 = vld [vmem:[#allocation6 + $0x2e4] sm:$0xf0]  ;;  %v2142_v48 = vor.u32 %v2466_v38, %v2141_v37  ;;  %v117_v54 = vld [vmem:[#allocation3 + $0x10] sm:$0xff]  ;;  %v1942_v55 = vor.u32 %v2416_v42, %v1941_v41  ;;  %s1620_s11 = sshll.u32 %s2810_s7, 4  ;;  %s1621_s11 = int_to_ptr.hbm [resolvable:$true] %s1620_s11 }
  0x31   :  { %954 = vmatpush.bf16.msra.mxu3 %v1846_v10  ;;  %v2069_v47 = vld [vmem:[#allocation6 + $0x360] sm:$0xf]  ;;  %v2448_v49 = vld [vmem:[#allocation6 + $0x364] sm:$0xf0]  ;;  %v1933_v56 = vld [vmem:[#allocation6 + $0x250] sm:$0xf]  ;;  %v2006_v60 = vor.u32 %v2432_v46, %v2005_v45 }
  0x32   :  { %913 = vmatpush.bf16.msra.mxu0 %v1646_v16  ;;  %v2133_v50 = vld [vmem:[#allocation6 + $0x3e0] sm:$0xf]  ;;  %v2464_v51 = vld [vmem:[#allocation6 + $0x3e4] sm:$0xf0]  ;;  %v2414_v57 = vld [vmem:[#allocation6 + $0x254] sm:$0xf0]  ;;  %v2070_v61 = vor.u32 %v2448_v49, %v2069_v47 }
  0x33   :  { %927 = vmatpush.bf16.msra.mxu1 %v1710_v19  ;;  %v115_v52 = vld [vmem:[#allocation3] sm:$0xff]  ;;  %v125_v59 = vld [vmem:[#allocation3 + $0x50] sm:$0xff]  ;;  %v2430_v63 = vld [vmem:[#allocation6 + $0x2d4] sm:$0xf0]  ;;  %v2134_v2 = vor.u32 %v2464_v51, %v2133_v50  ;;  %v1934_v9 = vor.u32 %v2414_v57, %v1933_v56 }
  0x34   :  { %941 = vmatpush.bf16.msra.mxu2 %v1774_v20  ;;  %v123_v53 = vld [vmem:[#allocation3 + $0x40] sm:$0xff]  ;;  %v1997_v62 = vld [vmem:[#allocation6 + $0x2d0] sm:$0xf]  ;;  %v2757_v1 = vpack.c.bf16 %v125_v59, %v117_v54  ;;  %v2446_v3 = vld [vmem:[#allocation6 + $0x354] sm:$0xf0] }
  0x35   :  { %955 = vmatpush.bf16.msra.mxu3 %v1838_v24  ;;  %v2755_v58 = vpack.c.bf16 %v123_v53, %v115_v52  ;;  %v2061_v0 = vld [vmem:[#allocation6 + $0x350] sm:$0xf]  ;;  %v2462_v5 = vld [vmem:[#allocation6 + $0x3d4] sm:$0xf0]  ;;  %v116_v6 = vld [vmem:[#allocation3 + $0x8] sm:$0xff]  ;;  %v1998_v12 = vor.u32 %v2430_v63, %v1997_v62 }
  0x36   :  { %914 = vmatpush.bf16.msra.mxu0 %v1638_v31  ;;  %v2125_v4 = vld [vmem:[#allocation6 + $0x3d0] sm:$0xf]  ;;  %v124_v7 = vld [vmem:[#allocation3 + $0x48] sm:$0xff]  ;;  %v118_v8 = vld [vmem:[#allocation3 + $0x18] sm:$0xff]  ;;  %v2062_v13 = vor.u32 %v2446_v3, %v2061_v0 }
  0x37   :  { %928 = vmatpush.bf16.msra.mxu1 %v1702_v35  ;;  %v2761_v10 = vpack.c.bf16 %v124_v7, %v116_v6  ;;  %v126_v11 = vld [vmem:[#allocation3 + $0x58] sm:$0xff]  ;;  %v1925_v14 = vld [vmem:[#allocation6 + $0x240] sm:$0xf]  ;;  %v2412_v15 = vld [vmem:[#allocation6 + $0x244] sm:$0xf0]  ;;  %v2126_v18 = vor.u32 %v2462_v5, %v2125_v4 }
  0x38   :  { %942 = vmatpush.bf16.msra.mxu2 %v1766_v36  ;;  %v1989_v16 = vld [vmem:[#allocation6 + $0x2c0] sm:$0xf]  ;;  %v2763_v17 = vpack.c.bf16 %v126_v11, %v118_v8  ;;  %v2428_v19 = vld [vmem:[#allocation6 + $0x2c4] sm:$0xf0]  ;;  %v1926_v24 = vor.u32 %v2412_v15, %v1925_v14  ;;  %v1917_v27 = vld [vmem:[#allocation6 + $0x230] sm:$0xf] }
  0x39   :  { %956 = vmatpush.bf16.msra.mxu3 %v1830_v39  ;;  %915 = vmatmul.bf16.vlgmr.msra.gmra.mxu0 %v2755_v58  ;;  %v2053_v20 = vld [vmem:[#allocation6 + $0x340] sm:$0xf]  ;;  %v2444_v21 = vld [vmem:[#allocation6 + $0x344] sm:$0xf0]  ;;  %v1990_v25 = vor.u32 %v2428_v19, %v1989_v16  ;;  %v2410_v28 = vld [vmem:[#allocation6 + $0x234] sm:$0xf0] }
  0x3a   :  { %963 = vmatpush.bf16.msrb.mxu0 %v1950_v40  ;;  %929 = vmatmul.bf16.vlgmr.msra.gmra.mxu1 %v2761_v10  ;;  %v2117_v22 = vld [vmem:[#allocation6 + $0x3c0] sm:$0xf]  ;;  %v2460_v23 = vld [vmem:[#allocation6 + $0x3c4] sm:$0xf0]  ;;  %v2054_v26 = vor.u32 %v2444_v21, %v2053_v20  ;;  %v1981_v29 = vld [vmem:[#allocation6 + $0x2b0] sm:$0xf]  ;;  %v1918_v36 = vor.u32 %v2410_v28, %v1917_v27 }
  0x3b   :  { %977 = vmatpush.bf16.msrb.mxu1 %v2014_v43  ;;  %943 = vmatmul.bf16.vlgmr.msra.gmra.mxu2 %v2757_v1  ;;  %v2118_v30 = vor.u32 %v2460_v23, %v2117_v22  ;;  %v2426_v31 = vld [vmem:[#allocation6 + $0x2b4] sm:$0xf0]  ;;  %v2045_v32 = vld [vmem:[#allocation6 + $0x330] sm:$0xf]  ;;  %v1909_v39 = vld [vmem:[#allocation6 + $0x220] sm:$0xf] }
  0x3c   :  { %991 = vmatpush.bf16.msrb.mxu2 %v2078_v44  ;;  %957 = vmatmul.bf16.vlgmr.msra.gmra.mxu3 %v2763_v17  ;;  %v2442_v33 = vld [vmem:[#allocation6 + $0x334] sm:$0xf0]  ;;  %v2109_v34 = vld [vmem:[#allocation6 + $0x3b0] sm:$0xf]  ;;  %v1982_v37 = vor.u32 %v2426_v31, %v1981_v29  ;;  %v2408_v40 = vld [vmem:[#allocation6 + $0x224] sm:$0xf0] }
  0x3d   :  { %1005 = vmatpush.bf16.msrb.mxu3 %v2142_v48  ;;  %v2458_v35 = vld [vmem:[#allocation6 + $0x3b4] sm:$0xf0]  ;;  %v2046_v38 = vor.u32 %v2442_v33, %v2045_v32  ;;  %v1973_v41 = vld [vmem:[#allocation6 + $0x2a0] sm:$0xf]  ;;  %v2424_v43 = vld [vmem:[#allocation6 + $0x2a4] sm:$0xf0]  ;;  %v1910_v48 = vor.u32 %v2408_v40, %v1909_v39 }
  0x3e   :  { %964 = vmatpush.bf16.msrb.mxu0 %v1942_v55  ;;  %v2110_v42 = vor.u32 %v2458_v35, %v2109_v34  ;;  %v2037_v44 = vld [vmem:[#allocation6 + $0x320] sm:$0xf]  ;;  %v2440_v45 = vld [vmem:[#allocation6 + $0x324] sm:$0xf0]  ;;  %v1901_v49 = vld [vmem:[#allocation6 + $0x210] sm:$0xf]  ;;  %v1974_v50 = vor.u32 %v2424_v43, %v1973_v41 }
  0x3f   :  { %978 = vmatpush.bf16.msrb.mxu1 %v2006_v60  ;;  %v2101_v46 = vld [vmem:[#allocation6 + $0x3a0] sm:$0xf]  ;;  %v2456_v47 = vld [vmem:[#allocation6 + $0x3a4] sm:$0xf0]  ;;  %v2038_v51 = vor.u32 %v2440_v45, %v2037_v44  ;;  %v2406_v52 = vld [vmem:[#allocation6 + $0x214] sm:$0xf0] }
  0x40   :  { %992 = vmatpush.bf16.msrb.mxu2 %v2070_v61  ;;  %v1965_v53 = vld [vmem:[#allocation6 + $0x290] sm:$0xf]  ;;  %v2422_v54 = vld [vmem:[#allocation6 + $0x294] sm:$0xf0]  ;;  %v2102_v55 = vor.u32 %v2456_v47, %v2101_v46  ;;  %v1893_v61 = vld [vmem:[#allocation6 + $0x200] sm:$0xf]  ;;  %v1902_v63 = vor.u32 %v2406_v52, %v1901_v49 }
  0x41   :  { %1006 = vmatpush.bf16.msrb.mxu3 %v2134_v2  ;;  %v2029_v56 = vld [vmem:[#allocation6 + $0x310] sm:$0xf]  ;;  %v2438_v57 = vld [vmem:[#allocation6 + $0x314] sm:$0xf0]  ;;  %v2404_v62 = vld [vmem:[#allocation6 + $0x204] sm:$0xf0]  ;;  %v1966_v5 = vor.u32 %v2422_v54, %v1965_v53 }
  0x42   :  { %965 = vmatpush.bf16.msrb.mxu0 %v1934_v9  ;;  %v2093_v59 = vld [vmem:[#allocation6 + $0x390] sm:$0xf]  ;;  %v2454_v60 = vld [vmem:[#allocation6 + $0x394] sm:$0xf0]  ;;  %v1957_v0 = vld [vmem:[#allocation6 + $0x280] sm:$0xf]  ;;  %v2030_v6 = vor.u32 %v2438_v57, %v2029_v56  ;;  %v1894_v19 = vor.u32 %v2404_v62, %v1893_v61 }
  0x43   :  { %979 = vmatpush.bf16.msrb.mxu1 %v1998_v12  ;;  %v2420_v2 = vld [vmem:[#allocation6 + $0x284] sm:$0xf0]  ;;  %v2021_v3 = vld [vmem:[#allocation6 + $0x300] sm:$0xf]  ;;  %v2353_v9 = vld [vmem:[#allocation6 + $0x74] sm:$0xf]  ;;  %v2094_v11 = vor.u32 %v2454_v60, %v2093_v59 }
  0x44   :  { %993 = vmatpush.bf16.msrb.mxu2 %v2062_v13  ;;  %v2436_v4 = vld [vmem:[#allocation6 + $0x304] sm:$0xf0]  ;;  %v2085_v7 = vld [vmem:[#allocation6 + $0x380] sm:$0xf]  ;;  %v1695_v12 = vld [vmem:[#allocation6 + $0x78] sm:$0xf0]  ;;  %v1958_v23 = vor.u32 %v2420_v2, %v1957_v0 }
  0x45   :  { %1007 = vmatpush.bf16.msrb.mxu3 %v2126_v18  ;;  %v2452_v8 = vld [vmem:[#allocation6 + $0x384] sm:$0xf0]  ;;  %v2369_v13 = vld [vmem:[#allocation6 + $0xf4] sm:$0xf]  ;;  %v1759_v14 = vld [vmem:[#allocation6 + $0xf8] sm:$0xf0]  ;;  %v1698_v29 = vor.u32 %v2353_v9, %v1695_v12 }
  0x46   :  { %966 = vmatpush.bf16.msrb.mxu0 %v1926_v24  ;;  %v2385_v15 = vld [vmem:[#allocation6 + $0x174] sm:$0xf]  ;;  %v1823_v16 = vld [vmem:[#allocation6 + $0x178] sm:$0xf0]  ;;  %v119_v21 = vld [vmem:[#allocation3 + $0x20] sm:$0xff]  ;;  %v2022_v24 = vor.u32 %v2436_v4, %v2021_v3  ;;  %v2086_v28 = vor.u32 %v2452_v8, %v2085_v7  ;;  %v1762_v33 = vor.u32 %v2369_v13, %v1759_v14 }
  0x47   :  { %980 = vmatpush.bf16.msrb.mxu1 %v1990_v25  ;;  %v2401_v18 = vld [vmem:[#allocation6 + $0x1f4] sm:$0xf]  ;;  %v1887_v20 = vld [vmem:[#allocation6 + $0x1f8] sm:$0xf0]  ;;  %v127_v22 = vld [vmem:[#allocation3 + $0x60] sm:$0xff]  ;;  %v1826_v34 = vor.u32 %v2385_v15, %v1823_v16 }
  0x48   :  { %994 = vmatpush.bf16.msrb.mxu2 %v2054_v26  ;;  %v121_v25 = vld [vmem:[#allocation3 + $0x30] sm:$0xff]  ;;  %v120_v27 = vld [vmem:[#allocation3 + $0x28] sm:$0xff]  ;;  %v122_v31 = vld [vmem:[#allocation3 + $0x38] sm:$0xff]  ;;  %v2767_v39 = vpack.c.bf16 %v127_v22, %v119_v21 }
  0x49   :  { %1008 = vmatpush.bf16.msrb.mxu3 %v2118_v30  ;;  %v129_v26 = vld [vmem:[#allocation3 + $0x70] sm:$0xff]  ;;  %v128_v30 = vld [vmem:[#allocation3 + $0x68] sm:$0xff]  ;;  %v130_v32 = vld [vmem:[#allocation3 + $0x78] sm:$0xff] }
  0x4a   :  { %967 = vmatpush.bf16.msrb.mxu0 %v1918_v36  ;;  %v2351_v35 = vld [vmem:[#allocation6 + $0x64] sm:$0xf]  ;;  %v1687_v36 = vld [vmem:[#allocation6 + $0x68] sm:$0xf0]  ;;  %v2769_v43 = vpack.c.bf16 %v129_v26, %v121_v25  ;;  %v2771_v44 = vpack.c.bf16 %v128_v30, %v120_v27  ;;  %v2773_v47 = vpack.c.bf16 %v130_v32, %v122_v31  ;;  %v1679_v52 = vld [vmem:[#allocation6 + $0x58] sm:$0xf0] }
  0x4b   :  { %981 = vmatpush.bf16.msrb.mxu1 %v1982_v37  ;;  %v2367_v37 = vld [vmem:[#allocation6 + $0xe4] sm:$0xf]  ;;  %v1751_v40 = vld [vmem:[#allocation6 + $0xe8] sm:$0xf0]  ;;  %v2365_v53 = vld [vmem:[#allocation6 + $0xd4] sm:$0xf] }
  0x4c   :  { %995 = vmatpush.bf16.msrb.mxu2 %v2046_v38  ;;  %v1890_v38 = vor.u32 %v2401_v18, %v1887_v20  ;;  %v2383_v41 = vld [vmem:[#allocation6 + $0x164] sm:$0xf]  ;;  %v1879_v46 = vld [vmem:[#allocation6 + $0x1e8] sm:$0xf0]  ;;  %v1754_v49 = vor.u32 %v2367_v37, %v1751_v40  ;;  %v2381_v56 = vld [vmem:[#allocation6 + $0x154] sm:$0xf] }
  0x4d   :  { %1009 = vmatpush.bf16.msrb.mxu3 %v2110_v42  ;;  %v1815_v42 = vld [vmem:[#allocation6 + $0x168] sm:$0xf0]  ;;  %v2399_v45 = vld [vmem:[#allocation6 + $0x1e4] sm:$0xf]  ;;  %v1807_v57 = vld [vmem:[#allocation6 + $0x158] sm:$0xf0] }
  0x4e   :  { %968 = vmatpush.bf16.msrb.mxu0 %v1910_v48  ;;  %v1690_v48 = vor.u32 %v2351_v35, %v1687_v36  ;;  %v1882_v54 = vor.u32 %v2399_v45, %v1879_v46  ;;  %v2397_v59 = vld [vmem:[#allocation6 + $0x1d4] sm:$0xf]  ;;  %v1871_v60 = vld [vmem:[#allocation6 + $0x1d8] sm:$0xf0]  ;;  %v2347_v0 = vld [vmem:[#allocation6 + $0x44] sm:$0xf] }
  0x4f   :  { %982 = vmatpush.bf16.msrb.mxu1 %v1974_v50  ;;  %v1818_v50 = vor.u32 %v2383_v41, %v1815_v42  ;;  %v1671_v2 = vld [vmem:[#allocation6 + $0x48] sm:$0xf0]  ;;  %v2363_v3 = vld [vmem:[#allocation6 + $0xc4] sm:$0xf]  ;;  %v1874_v4 = vor.u32 %v2397_v59, %v1871_v60  ;;  %v2345_v14 = vld [vmem:[#allocation6 + $0x34] sm:$0xf] }
  0x50   :  { %996 = vmatpush.bf16.msrb.mxu2 %v2038_v51  ;;  %v2349_v51 = vld [vmem:[#allocation6 + $0x54] sm:$0xf]  ;;  %v1799_v7 = vld [vmem:[#allocation6 + $0x148] sm:$0xf0]  ;;  %v2395_v8 = vld [vmem:[#allocation6 + $0x1c4] sm:$0xf] }
  0x51   :  { %1010 = vmatpush.bf16.msrb.mxu3 %v2102_v55  ;;  %v1743_v55 = vld [vmem:[#allocation6 + $0xd8] sm:$0xf0]  ;;  %v1682_v61 = vor.u32 %v2349_v51, %v1679_v52  ;;  %v1863_v9 = vld [vmem:[#allocation6 + $0x1c8] sm:$0xf0]  ;;  %v2361_v16 = vld [vmem:[#allocation6 + $0xb4] sm:$0xf] }
  0x52   :  { %969 = vmatpush.bf16.msrb.mxu0 %v1902_v63  ;;  %v1746_v62 = vor.u32 %v2365_v53, %v1743_v55  ;;  %v1810_v63 = vor.u32 %v2381_v56, %v1807_v57  ;;  %v1663_v15 = vld [vmem:[#allocation6 + $0x38] sm:$0xf0]  ;;  %v1866_v18 = vor.u32 %v2395_v8, %v1863_v9  ;;  %v2377_v20 = vld [vmem:[#allocation6 + $0x134] sm:$0xf]  ;;  %v2343_v27 = vld [vmem:[#allocation6 + $0x24] sm:$0xf] }
  0x53   :  { %983 = vmatpush.bf16.msrb.mxu1 %v1966_v5  ;;  %v1735_v5 = vld [vmem:[#allocation6 + $0xc8] sm:$0xf0]  ;;  %v1791_v21 = vld [vmem:[#allocation6 + $0x138] sm:$0xf0]  ;;  %v2393_v22 = vld [vmem:[#allocation6 + $0x1b4] sm:$0xf] }
  0x54   :  { %997 = vmatpush.bf16.msrb.mxu2 %v2030_v6  ;;  %v2379_v6 = vld [vmem:[#allocation6 + $0x144] sm:$0xf]  ;;  %v1738_v12 = vor.u32 %v2363_v3, %v1735_v5  ;;  %v1794_v26 = vor.u32 %v2377_v20, %v1791_v21  ;;  %v1719_v31 = vld [vmem:[#allocation6 + $0xa8] sm:$0xf0]  ;;  %v2341_v40 = vld [vmem:[#allocation6 + $0x14] sm:$0xf] }
  0x55   :  { %1011 = vmatpush.bf16.msrb.mxu3 %v2094_v11  ;;  %v1674_v11 = vor.u32 %v2347_v0, %v1671_v2  ;;  %v1802_v13 = vor.u32 %v2379_v6, %v1799_v7  ;;  %v2375_v32 = vld [vmem:[#allocation6 + $0x124] sm:$0xf]  ;;  %v1847_v35 = vld [vmem:[#allocation6 + $0x1a8] sm:$0xf0]  ;;  %v1647_v41 = vld [vmem:[#allocation6 + $0x18] sm:$0xf0] }
  0x56   :  { %970 = vmatpush.bf16.msrb.mxu0 %v1894_v19  ;;  %v1727_v19 = vld [vmem:[#allocation6 + $0xb8] sm:$0xf0]  ;;  %v2357_v42 = vld [vmem:[#allocation6 + $0x94] sm:$0xf]  ;;  %v1650_v52 = vor.u32 %v2341_v40, %v1647_v41  ;;  %v2339_v53 = vld [vmem:[#allocation6 + $0x4] sm:$0xf] }
  0x57   :  { %984 = vmatpush.bf16.msrb.mxu1 %v1958_v23  ;;  %v1855_v23 = vld [vmem:[#allocation6 + $0x1b8] sm:$0xf0]  ;;  %v1730_v25 = vor.u32 %v2361_v16, %v1727_v19  ;;  %v2355_v57 = vld [vmem:[#allocation6 + $0x84] sm:$0xf]  ;;  %v1703_v59 = vld [vmem:[#allocation6 + $0x88] sm:$0xf0] }
  0x58   :  { %998 = vmatpush.bf16.msrb.mxu2 %v2022_v24  ;;  %v1666_v24 = vor.u32 %v2345_v14, %v1663_v15  ;;  %v1858_v30 = vor.u32 %v2393_v22, %v1855_v23  ;;  %v1711_v46 = vld [vmem:[#allocation6 + $0x98] sm:$0xf0]  ;;  %v2371_v60 = vld [vmem:[#allocation6 + $0x104] sm:$0xf]  ;;  %v1831_v0 = vld [vmem:[#allocation6 + $0x188] sm:$0xf0]  ;;  %v1706_v9 = vor.u32 %v2355_v57, %v1703_v59 }
  0x59   :  { %1012 = vmatpush.bf16.msrb.mxu3 %v2086_v28  ;;  %971 = vmatmul.bf16.vlgmr.msrb.gmra.mxu0 %v2767_v39  ;;  %v1655_v28 = vld [vmem:[#allocation6 + $0x28] sm:$0xf0]  ;;  %v1839_v51 = vld [vmem:[#allocation6 + $0x198] sm:$0xf0]  ;;  %v1714_v55 = vor.u32 %v2357_v42, %v1711_v46  ;;  %v2417_v2 = vld [vmem:[#allocation6 + $0x274] sm:$0xf] }
  0x5a   :  { %1019 = vmatpush.bf16.msra.mxu0 %v1698_v29  ;;  %985 = vmatmul.bf16.vlgmr.msrb.gmra.mxu1 %v2771_v44  ;;  %v2359_v29 = vld [vmem:[#allocation6 + $0xa4] sm:$0xf]  ;;  %v1658_v36 = vor.u32 %v2343_v27, %v1655_v28  ;;  %v1951_v3 = vld [vmem:[#allocation6 + $0x278] sm:$0xf0]  ;;  %v2449_v7 = vld [vmem:[#allocation6 + $0x374] sm:$0xf] }
  0x5b   :  { %1033 = vmatpush.bf16.msra.mxu1 %v1762_v33  ;;  %999 = vmatmul.bf16.vlgmr.msrb.gmra.mxu2 %v2769_v43  ;;  %v1783_v33 = vld [vmem:[#allocation6 + $0x128] sm:$0xf0]  ;;  %v1722_v37 = vor.u32 %v2359_v29, %v1719_v31  ;;  %v2015_v6 = vld [vmem:[#allocation6 + $0x2f8] sm:$0xf0]  ;;  %v1954_v15 = vor.u32 %v2417_v2, %v1951_v3  ;;  %v2415_v16 = vld [vmem:[#allocation6 + $0x264] sm:$0xf] }
  0x5c   :  { %1047 = vmatpush.bf16.msra.mxu2 %v1826_v34  ;;  %1013 = vmatmul.bf16.vlgmr.msrb.gmra.mxu3 %v2773_v47  ;;  %v2391_v34 = vld [vmem:[#allocation6 + $0x1a4] sm:$0xf]  ;;  %v2079_v8 = vld [vmem:[#allocation6 + $0x378] sm:$0xf0]  ;;  %v1943_v20 = vld [vmem:[#allocation6 + $0x268] sm:$0xf0] }
  0x5d   :  { %1061 = vmatpush.bf16.msra.mxu3 %v1890_v38  ;;  %v1786_v38 = vor.u32 %v2375_v32, %v1783_v33  ;;  %v1850_v45 = vor.u32 %v2391_v34, %v1847_v35  ;;  %v2082_v19 = vor.u32 %v2449_v7, %v2079_v8  ;;  %v2431_v21 = vld [vmem:[#allocation6 + $0x2e4] sm:$0xf]  ;;  %v2007_v23 = vld [vmem:[#allocation6 + $0x2e8] sm:$0xf0]  ;;  %v1946_v28 = vor.u32 %v2415_v16, %v1943_v20  ;;  %v2413_v31 = vld [vmem:[#allocation6 + $0x254] sm:$0xf] }
  0x5e   :  { %1020 = vmatpush.bf16.msra.mxu0 %v1690_v48  ;;  %v2373_v48 = vld [vmem:[#allocation6 + $0x114] sm:$0xf]  ;;  %v2135_v27 = vld [vmem:[#allocation6 + $0x3e8] sm:$0xf0]  ;;  %v2010_v29 = vor.u32 %v2431_v21, %v2007_v23  ;;  %v1935_v32 = vld [vmem:[#allocation6 + $0x258] sm:$0xf0] }
  0x5f   :  { %1034 = vmatpush.bf16.msra.mxu1 %v1754_v49  ;;  %v1775_v49 = vld [vmem:[#allocation6 + $0x118] sm:$0xf0]  ;;  %v2429_v33 = vld [vmem:[#allocation6 + $0x2d4] sm:$0xf]  ;;  %v1938_v41 = vor.u32 %v2413_v31, %v1935_v32  ;;  %v2411_v46 = vld [vmem:[#allocation6 + $0x244] sm:$0xf] }
  0x60   :  { %1048 = vmatpush.bf16.msra.mxu2 %v1818_v50  ;;  %v2389_v50 = vld [vmem:[#allocation6 + $0x194] sm:$0xf]  ;;  %v1778_v56 = vor.u32 %v2373_v48, %v1775_v49  ;;  %v1999_v35 = vld [vmem:[#allocation6 + $0x2d8] sm:$0xf0]  ;;  %v1927_v48 = vld [vmem:[#allocation6 + $0x248] sm:$0xf0] }
  0x61   :  { %1062 = vmatpush.bf16.msra.mxu3 %v1882_v54  ;;  %v1639_v54 = vld [vmem:[#allocation6 + $0x8] sm:$0xf0]  ;;  %v2127_v40 = vld [vmem:[#allocation6 + $0x3d8] sm:$0xf0]  ;;  %v2002_v42 = vor.u32 %v2429_v33, %v1999_v35  ;;  %v2425_v57 = vld [vmem:[#allocation6 + $0x2b4] sm:$0xf] }
  0x62   :  { %1021 = vmatpush.bf16.msra.mxu0 %v1682_v61  ;;  %v1842_v61 = vor.u32 %v2389_v50, %v1839_v51  ;;  %v1642_v5 = vor.u32 %v2339_v53, %v1639_v54  ;;  %v1991_v50 = vld [vmem:[#allocation6 + $0x2c8] sm:$0xf0]  ;;  %v2443_v51 = vld [vmem:[#allocation6 + $0x344] sm:$0xf]  ;;  %v1903_v20 = vld [vmem:[#allocation6 + $0x218] sm:$0xf0] }
  0x63   :  { %1035 = vmatpush.bf16.msra.mxu1 %v1746_v62  ;;  %v1767_v62 = vld [vmem:[#allocation6 + $0x108] sm:$0xf0]  ;;  %v2423_v7 = vld [vmem:[#allocation6 + $0x2a4] sm:$0xf]  ;;  %v2421_v21 = vld [vmem:[#allocation6 + $0x294] sm:$0xf] }
  0x64   :  { %1049 = vmatpush.bf16.msra.mxu2 %v1810_v63  ;;  %v2387_v63 = vld [vmem:[#allocation6 + $0x184] sm:$0xf]  ;;  %v2119_v53 = vld [vmem:[#allocation6 + $0x3c8] sm:$0xf0]  ;;  %v1967_v23 = vld [vmem:[#allocation6 + $0x298] sm:$0xf0] }
  0x65   :  { %1063 = vmatpush.bf16.msra.mxu3 %v1874_v4  ;;  %v2433_v4 = vld [vmem:[#allocation6 + $0x2f4] sm:$0xf]  ;;  %v1834_v14 = vor.u32 %v2387_v63, %v1831_v0  ;;  %v2111_v0 = vld [vmem:[#allocation6 + $0x3b8] sm:$0xf0]  ;;  %v2403_v31 = vld [vmem:[#allocation6 + $0x204] sm:$0xf] }
  0x66   :  { %1022 = vmatpush.bf16.msra.mxu0 %v1674_v11  ;;  %v1770_v11 = vor.u32 %v2371_v60, %v1767_v62  ;;  %v1983_v60 = vld [vmem:[#allocation6 + $0x2b8] sm:$0xf0]  ;;  %v2457_v63 = vld [vmem:[#allocation6 + $0x3b4] sm:$0xf]  ;;  %v1895_v32 = vld [vmem:[#allocation6 + $0x208] sm:$0xf0] }
  0x67   :  { %1036 = vmatpush.bf16.msra.mxu1 %v1738_v12  ;;  %v2465_v12 = vld [vmem:[#allocation6 + $0x3f4] sm:$0xf]  ;;  %v2047_v62 = vld [vmem:[#allocation6 + $0x338] sm:$0xf0]  ;;  %v1986_v3 = vor.u32 %v2425_v57, %v1983_v60  ;;  %v2114_v8 = vor.u32 %v2457_v63, %v2111_v0  ;;  %v2419_v33 = vld [vmem:[#allocation6 + $0x284] sm:$0xf] }
  0x68   :  { %1050 = vmatpush.bf16.msra.mxu2 %v1802_v13  ;;  %v2143_v13 = vld [vmem:[#allocation6 + $0x3f8] sm:$0xf0]  ;;  %v1959_v35 = vld [vmem:[#allocation6 + $0x288] sm:$0xf0] }
  0x69   :  { %1064 = vmatpush.bf16.msra.mxu3 %v1866_v18  ;;  %v2018_v18 = vor.u32 %v2433_v4, %v2015_v6  ;;  %v2146_v22 = vor.u32 %v2465_v12, %v2143_v13  ;;  %v1911_v6 = vld [vmem:[#allocation6 + $0x228] sm:$0xf0]  ;;  %v2455_v13 = vld [vmem:[#allocation6 + $0x3a4] sm:$0xf] }
  0x6a   :  { %1023 = vmatpush.bf16.msra.mxu0 %v1666_v24  ;;  %v2447_v24 = vld [vmem:[#allocation6 + $0x364] sm:$0xf]  ;;  %v2039_v12 = vld [vmem:[#allocation6 + $0x328] sm:$0xf0] }
  0x6b   :  { %1037 = vmatpush.bf16.msra.mxu1 %v1730_v25  ;;  %v2071_v25 = vld [vmem:[#allocation6 + $0x368] sm:$0xf0] }
  0x6c   :  { %1051 = vmatpush.bf16.msra.mxu2 %v1794_v26  ;;  %v2463_v26 = vld [vmem:[#allocation6 + $0x3e4] sm:$0xf]  ;;  %v2476_v60 = vld [vmem:[#allocation9 + $0x44] sm:$0xf0]  ;;  %v2183_v63 = vld [vmem:[#allocation9 + $0x48] sm:$0xf0] }
  0x6d   :  { %1065 = vmatpush.bf16.msra.mxu3 %v1858_v30  ;;  %v2074_v30 = vor.u32 %v2447_v24, %v2071_v25  ;;  %v2138_v34 = vor.u32 %v2463_v26, %v2135_v27  ;;  %v2437_v24 = vld [vmem:[#allocation6 + $0x314] sm:$0xf]  ;;  %v2031_v25 = vld [vmem:[#allocation6 + $0x318] sm:$0xf0] }
  0x6e   :  { %1024 = vmatpush.bf16.msra.mxu0 %v1658_v36  ;;  %v2445_v36 = vld [vmem:[#allocation6 + $0x354] sm:$0xf]  ;;  %v2095_v27 = vld [vmem:[#allocation6 + $0x398] sm:$0xf0] }
  0x6f   :  { %1038 = vmatpush.bf16.msra.mxu1 %v1722_v37  ;;  %v2063_v37 = vld [vmem:[#allocation6 + $0x358] sm:$0xf0]  ;;  %v2453_v26 = vld [vmem:[#allocation6 + $0x394] sm:$0xf] }
  0x70   :  { %1052 = vmatpush.bf16.msra.mxu2 %v1786_v38  ;;  %v2461_v38 = vld [vmem:[#allocation6 + $0x3d4] sm:$0xf] }
  0x71   :  { %1066 = vmatpush.bf16.msra.mxu3 %v1850_v45  ;;  %v2066_v45 = vor.u32 %v2445_v36, %v2063_v37  ;;  %v2130_v49 = vor.u32 %v2461_v38, %v2127_v40  ;;  %v2435_v36 = vld [vmem:[#allocation6 + $0x304] sm:$0xf]  ;;  %v2023_v37 = vld [vmem:[#allocation6 + $0x308] sm:$0xf0] }
  0x72   :  { %1025 = vmatpush.bf16.msra.mxu0 %v1650_v52  ;;  %v2459_v52 = vld [vmem:[#allocation6 + $0x3c4] sm:$0xf]  ;;  %v2087_v40 = vld [vmem:[#allocation6 + $0x388] sm:$0xf0] }
  0x73   :  { %1039 = vmatpush.bf16.msra.mxu1 %v1714_v55  ;;  %v2409_v55 = vld [vmem:[#allocation6 + $0x234] sm:$0xf]  ;;  %v2122_v59 = vor.u32 %v2459_v52, %v2119_v53  ;;  %v2451_v38 = vld [vmem:[#allocation6 + $0x384] sm:$0xf]  ;;  %v2480_v53 = vld [vmem:[#allocation9 + $0x64] sm:$0xf0] }
  0x74   :  { %1053 = vmatpush.bf16.msra.mxu2 %v1778_v56  ;;  %v1919_v56 = vld [vmem:[#allocation6 + $0x238] sm:$0xf0]  ;;  %v2197_v52 = vld [vmem:[#allocation9 + $0x60] sm:$0xf] }
  0x75   :  { %1067 = vmatpush.bf16.msra.mxu3 %v1842_v61  ;;  %v2441_v61 = vld [vmem:[#allocation6 + $0x334] sm:$0xf]  ;;  %v1922_v2 = vor.u32 %v2409_v55, %v1919_v56  ;;  %v2191_v56 = vld [vmem:[#allocation9 + $0x58] sm:$0xf0] }
  0x76   :  { %1026 = vmatpush.bf16.msra.mxu0 %v1642_v5  ;;  %v2050_v4 = vor.u32 %v2441_v61, %v2047_v62  ;;  %v2407_v5 = vld [vmem:[#allocation6 + $0x224] sm:$0xf]  ;;  %v2477_v55 = vld [vmem:[#allocation9 + $0x54] sm:$0xf] }
  0x77   :  { %1040 = vmatpush.bf16.msra.mxu1 %v1706_v9  ;;  %v1975_v9 = vld [vmem:[#allocation6 + $0x2a8] sm:$0xf0]  ;;  %v2194_v57 = vor.u32 %v2477_v55, %v2191_v56  ;;  %v2475_v61 = vld [vmem:[#allocation9 + $0x44] sm:$0xf]  ;;  %v2498_v55 = vld [vmem:[#allocation9 + $0xf4] sm:$0xf0] }
  0x78   :  { %1054 = vmatpush.bf16.msra.mxu2 %v1770_v11  ;;  %v2439_v11 = vld [vmem:[#allocation6 + $0x324] sm:$0xf]  ;;  %v1978_v16 = vor.u32 %v2423_v7, %v1975_v9  ;;  %v2186_v0 = vor.u32 %v2475_v61, %v2183_v63 }
  0x79   :  { %1068 = vmatpush.bf16.msra.mxu3 %v1834_v14  ;;  %1027 = vmatmul.bf16.vlgmr.msra.gmra.mxu0 %v2755_v58  ;;  %v1930_v58 = vor.u32 %v2411_v46, %v1927_v48  ;;  %v2103_v14 = vld [vmem:[#allocation6 + $0x3a8] sm:$0xf0]  ;;  %v2090_v46 = vor.u32 %v2451_v38, %v2087_v40  ;;  %v2205_v48 = vld [vmem:[#allocation9 + $0x70] sm:$0xf]  ;;  %v2261_v61 = vld [vmem:[#allocation9 + $0xe0] sm:$0xf] }
  0x7a   :  { %1075 = vmatpush.bf16.msrb.mxu0 %v1954_v15  ;;  %1041 = vmatmul.bf16.vlgmr.msra.gmra.mxu1 %v2761_v10  ;;  %v1914_v15 = vor.u32 %v2407_v5, %v1911_v6  ;;  %v2473_v5 = vld [vmem:[#allocation9 + $0x34] sm:$0xf]  ;;  %v2175_v6 = vld [vmem:[#allocation9 + $0x38] sm:$0xf0] }
  0x7b   :  { %1089 = vmatpush.bf16.msrb.mxu1 %v2018_v18  ;;  %1055 = vmatmul.bf16.vlgmr.msra.gmra.mxu2 %v2757_v1  ;;  %v2427_v1 = vld [vmem:[#allocation6 + $0x2c4] sm:$0xf]  ;;  %v2042_v18 = vor.u32 %v2439_v11, %v2039_v12  ;;  %v2472_v12 = vld [vmem:[#allocation9 + $0x24] sm:$0xf0] }
  0x7c   :  { %1103 = vmatpush.bf16.msrb.mxu2 %v2082_v19  ;;  %1069 = vmatmul.bf16.vlgmr.msra.gmra.mxu3 %v2763_v17  ;;  %v2055_v17 = vld [vmem:[#allocation6 + $0x348] sm:$0xf0]  ;;  %v1994_v54 = vor.u32 %v2427_v1, %v1991_v50  ;;  %v2405_v19 = vld [vmem:[#allocation6 + $0x214] sm:$0xf]  ;;  %v2482_v1 = vld [vmem:[#allocation9 + $0x74] sm:$0xf0] }
  0x7d   :  { %1117 = vmatpush.bf16.msrb.mxu3 %v2146_v22  ;;  %v2058_v10 = vor.u32 %v2443_v51, %v2055_v17  ;;  %v2106_v22 = vor.u32 %v2455_v13, %v2103_v14  ;;  %v2206_v50 = vor.u32 %v2482_v1, %v2205_v48  ;;  %v2207_v51 = vld [vmem:[#allocation9 + $0x78] sm:$0xf0]  ;;  %v2165_v11 = vld [vmem:[#allocation9 + $0x20] sm:$0xf]  ;;  %v2471_v13 = vld [vmem:[#allocation9 + $0x24] sm:$0xf] }
  0x7e   :  { %1076 = vmatpush.bf16.msrb.mxu0 %v1946_v28  ;;  %v1906_v28 = vor.u32 %v2405_v19, %v1903_v20  ;;  %v2166_v14 = vor.u32 %v2472_v12, %v2165_v11  ;;  %v2470_v19 = vld [vmem:[#allocation9 + $0x14] sm:$0xf0]  ;;  %v2469_v20 = vld [vmem:[#allocation9 + $0x14] sm:$0xf]  ;;  %v2253_v12 = vld [vmem:[#allocation9 + $0xd0] sm:$0xf] }
  0x7f   :  { %1090 = vmatpush.bf16.msrb.mxu1 %v2010_v29  ;;  %v1970_v29 = vor.u32 %v2421_v21, %v1967_v23  ;;  %v2159_v23 = vld [vmem:[#allocation9 + $0x18] sm:$0xf0] }
  0x80   :  { %1104 = vmatpush.bf16.msrb.mxu2 %v2074_v30  ;;  %v2034_v30 = vor.u32 %v2437_v24, %v2031_v25  ;;  %v2162_v25 = vor.u32 %v2469_v20, %v2159_v23  ;;  %v2492_v20 = vld [vmem:[#allocation9 + $0xc4] sm:$0xf0]  ;;  %v2247_v23 = vld [vmem:[#allocation9 + $0xc8] sm:$0xf0] }
  0x81   :  { %1118 = vmatpush.bf16.msrb.mxu3 %v2138_v34  ;;  %v2098_v34 = vor.u32 %v2453_v26, %v2095_v27 }
  0x82   :  { %1077 = vmatpush.bf16.msrb.mxu0 %v1938_v41  ;;  %v1898_v41 = vor.u32 %v2403_v31, %v1895_v32 }
  0x83   :  { %1091 = vmatpush.bf16.msrb.mxu1 %v2002_v42  ;;  %v1962_v42 = vor.u32 %v2419_v33, %v1959_v35  ;;  %v2151_v33 = vld [vmem:[#allocation9 + $0x8] sm:$0xf0] }
  0x84   :  { %1105 = vmatpush.bf16.msrb.mxu2 %v2066_v45  ;;  %v2026_v45 = vor.u32 %v2435_v36, %v2023_v37 }
  0x85   :  { %1119 = vmatpush.bf16.msrb.mxu3 %v2130_v49  ;;  %v2481_v49 = vld [vmem:[#allocation9 + $0x74] sm:$0xf] }
  0x86   :  { %1078 = vmatpush.bf16.msrb.mxu0 %v1930_v58  ;;  %v2210_v17 = vor.u32 %v2481_v49, %v2207_v51  ;;  %v2479_v58 = vld [vmem:[#allocation9 + $0x64] sm:$0xf] }
  0x87   :  { %1092 = vmatpush.bf16.msrb.mxu1 %v1994_v54  ;;  %v2198_v54 = vor.u32 %v2480_v53, %v2197_v52  ;;  %v2787_v53 = vld [vmem:[#allocation8] sm:$0x3] }
  0x88   :  { %1106 = vmatpush.bf16.msrb.mxu2 %v2058_v10  ;;  %v2199_v10 = vld [vmem:[#allocation9 + $0x68] sm:$0xf0] }
  0x89   :  { %1120 = vmatpush.bf16.msrb.mxu3 %v2122_v59  ;;  %v2181_v59 = vld [vmem:[#allocation9 + $0x40] sm:$0xf] }
  0x8a   :  { %1079 = vmatpush.bf16.msrb.mxu0 %v1922_v2  ;;  %v2182_v62 = vor.u32 %v2476_v60, %v2181_v59  ;;  %v2173_v2 = vld [vmem:[#allocation9 + $0x30] sm:$0xf]  ;;  %v2271_v60 = vld [vmem:[#allocation9 + $0xf8] sm:$0xf0] }
  0x8b   :  { %1093 = vmatpush.bf16.msrb.mxu1 %v1986_v3  ;;  %v2474_v3 = vld [vmem:[#allocation9 + $0x34] sm:$0xf0] }
  0x8c   :  { %1107 = vmatpush.bf16.msrb.mxu2 %v2050_v4  ;;  %v2174_v4 = vor.u32 %v2474_v3, %v2173_v2  ;;  %v2263_v2 = vld [vmem:[#allocation9 + $0xe8] sm:$0xf0] }
  0x8d   :  { %1121 = vmatpush.bf16.msrb.mxu3 %v2114_v8  ;;  %v2178_v8 = vor.u32 %v2473_v5, %v2175_v6 }
  0x8e   :  { %1080 = vmatpush.bf16.msrb.mxu0 %v1914_v15  ;;  %v2167_v15 = vld [vmem:[#allocation9 + $0x28] sm:$0xf0] }
  0x8f   :  { %1094 = vmatpush.bf16.msrb.mxu1 %v1978_v16  ;;  %v2170_v16 = vor.u32 %v2471_v13, %v2167_v15  ;;  %v2494_v13 = vld [vmem:[#allocation9 + $0xd4] sm:$0xf0] }
  0x90   :  { %1108 = vmatpush.bf16.msrb.mxu2 %v2042_v18  ;;  %v2157_v18 = vld [vmem:[#allocation9 + $0x10] sm:$0xf]  ;;  %v2254_v15 = vor.u32 %v2494_v13, %v2253_v12 }
  0x91   :  { %1122 = vmatpush.bf16.msrb.mxu3 %v2106_v22  ;;  %v2158_v22 = vor.u32 %v2470_v19, %v2157_v18  ;;  %v2245_v19 = vld [vmem:[#allocation9 + $0xc0] sm:$0xf] }
  0x92   :  { %1081 = vmatpush.bf16.msrb.mxu0 %v1906_v28  ;;  %v2149_v28 = vld [vmem:[#allocation9] sm:$0xf] }
  0x93   :  { %1095 = vmatpush.bf16.msrb.mxu1 %v1970_v29  ;;  %v2468_v29 = vld [vmem:[#allocation9 + $0x4] sm:$0xf0] }
  0x94   :  { %1109 = vmatpush.bf16.msrb.mxu2 %v2034_v30  ;;  %v2467_v30 = vld [vmem:[#allocation9 + $0x4] sm:$0xf]  ;;  %v2150_v32 = vor.u32 %v2468_v29, %v2149_v28  ;;  %v2239_v29 = vld [vmem:[#allocation9 + $0xb8] sm:$0xf0] }
  0x95   :  { %1123 = vmatpush.bf16.msrb.mxu3 %v2098_v34  ;;  %v2154_v34 = vor.u32 %v2467_v30, %v2151_v33  ;;  %v2487_v33 = vld [vmem:[#allocation9 + $0xa4] sm:$0xf] }
  0x96   :  { %1082 = vmatpush.bf16.msrb.mxu0 %v1898_v41 }
  0x97   :  { %1096 = vmatpush.bf16.msrb.mxu1 %v1962_v42 }
  0x98   :  { %1110 = vmatpush.bf16.msrb.mxu2 %v2026_v45 }
  0x99   :  { %1124 = vmatpush.bf16.msrb.mxu3 %v2090_v46  ;;  %1083 = vmatmul.bf16.vlgmr.msrb.gmra.mxu0 %v2767_v39  ;;  %v2202_v39 = vor.u32 %v2479_v58, %v2199_v10  ;;  %v1148_v10 = vperm.slane %v2787_v53, 0 }
  0x9a   :  { %1097 = vmatmul.bf16.vlgmr.msrb.gmra.mxu1 %v2771_v44  ;;  %1360 = vmatpush.bf16.msra.mxu0 %v2206_v50  ;;  %v2189_v44 = vld [vmem:[#allocation9 + $0x50] sm:$0xf] }
  0x9b   :  { %1111 = vmatmul.bf16.vlgmr.msrb.gmra.mxu2 %v2769_v43  ;;  %v2478_v43 = vld [vmem:[#allocation9 + $0x54] sm:$0xf0] }
  0x9c   :  { %1125 = vmatmul.bf16.vlgmr.msrb.gmra.mxu3 %v2773_v47  ;;  %1388 = vmatpush.bf16.msra.mxu2 %v2210_v17  ;;  %v2190_v47 = vor.u32 %v2478_v43, %v2189_v44  ;;  %v2269_v43 = vld [vmem:[#allocation9 + $0xf0] sm:$0xf] }
  0x9d   :  { %v2270_v59 = vor.u32 %v2498_v55, %v2269_v43 }
  0x9e   :  { %1361 = vmatpush.bf16.msra.mxu0 %v2198_v54 }
  0x9f   :  { %1374 = vmatpush.bf16.msra.mxu1 %v2270_v59 }
  0xa0   :  { %1389 = vmatpush.bf16.msra.mxu2 %v2202_v39 }
  0xa2   :  { %1362 = vmatpush.bf16.msra.mxu0 %v2190_v47  ;;  %v2497_v47 = vld [vmem:[#allocation9 + $0xf4] sm:$0xf] }
  0xa3   :  { %v2274_v63 = vor.u32 %v2497_v47, %v2271_v60 }
  0xa4   :  { %1390 = vmatpush.bf16.msra.mxu2 %v2194_v57 }
  0xa5   :  { %1402 = vmatpush.bf16.msra.mxu3 %v2274_v63 }
  0xa6   :  { %1363 = vmatpush.bf16.msra.mxu0 %v2182_v62  ;;  %v2496_v62 = vld [vmem:[#allocation9 + $0xe4] sm:$0xf0] }
  0xa7   :  { %v2262_v5 = vor.u32 %v2496_v62, %v2261_v61 }
  0xa8   :  { %1391 = vmatpush.bf16.msra.mxu2 %v2186_v0  ;;  %v2495_v0 = vld [vmem:[#allocation9 + $0xe4] sm:$0xf] }
  0xa9   :  { %v2266_v6 = vor.u32 %v2495_v0, %v2263_v2  ;;  %1375 = vmatpush.bf16.msra.mxu1 %v2262_v5 }
  0xaa   :  { %1364 = vmatpush.bf16.msra.mxu0 %v2174_v4 }
  0xab   :  { %1403 = vmatpush.bf16.msra.mxu3 %v2266_v6 }
  0xac   :  { %1392 = vmatpush.bf16.msra.mxu2 %v2178_v8 }
  0xad   :  { %1376 = vmatpush.bf16.msra.mxu1 %v2254_v15 }
  0xae   :  { %1365 = vmatpush.bf16.msra.mxu0 %v2166_v14  ;;  %v2493_v14 = vld [vmem:[#allocation9 + $0xd4] sm:$0xf] }
  0xb0   :  { %1393 = vmatpush.bf16.msra.mxu2 %v2170_v16  ;;  %v2255_v16 = vld [vmem:[#allocation9 + $0xd8] sm:$0xf0] }
  0xb1   :  { %v2258_v18 = vor.u32 %v2493_v14, %v2255_v16 }
  0xb2   :  { %1366 = vmatpush.bf16.msra.mxu0 %v2158_v22  ;;  %v2246_v22 = vor.u32 %v2492_v20, %v2245_v19 }
  0xb3   :  { %1404 = vmatpush.bf16.msra.mxu3 %v2258_v18 }
  0xb4   :  { %1394 = vmatpush.bf16.msra.mxu2 %v2162_v25  ;;  %1377 = vmatpush.bf16.msra.mxu1 %v2246_v22  ;;  %v2237_v25 = vld [vmem:[#allocation9 + $0xb0] sm:$0xf]  ;;  %v2506_v22 = vld [vmem:[#allocation11 + $0x38] sm:$0xff] }
  0xb6   :  { %v916_v7 = vpop.f32.mrf.mxu0  ;;  %1367 = vmatpush.bf16.msra.mxu0 %v2150_v32  ;;  %v2488_v32 = vld [vmem:[#allocation9 + $0xa4] sm:$0xf0] }
  0xb7   :  { %v930_v9 = vpop.f32.mrf.mxu1 }
  0xb8   :  { %v931_v26 = vadd.f32 %v930_v9, %v916_v7  ;;  %1395 = vmatpush.bf16.msra.mxu2 %v2154_v34 }
  0xba   :  { %1554 = vmatpush.bf16.msrb.mxu0 %v2506_v22 }
  0xbe   :  { %v944_v21 = vpop.f32.mrf.mxu2  ;;  %v918_v27 = vpop.f32.mrf.mxu0 }
  0xbf   :  { %v958_v24 = vpop.f32.mrf.mxu3  ;;  %v932_v31 = vpop.f32.mrf.mxu1  ;;  %v945_v35 = vadd.f32 %v944_v21, %v931_v26  ;;  %v2491_v21 = vld [vmem:[#allocation9 + $0xc4] sm:$0xf]  ;;  %v2490_v26 = vld [vmem:[#allocation9 + $0xb4] sm:$0xf0] }
  0xc0   :  { %v933_v40 = vadd.f32 %v932_v31, %v918_v27  ;;  %v2489_v27 = vld [vmem:[#allocation9 + $0xb4] sm:$0xf]  ;;  %v2238_v28 = vor.u32 %v2490_v26, %v2237_v25  ;;  %v2229_v31 = vld [vmem:[#allocation9 + $0xa0] sm:$0xf]  ;;  %v2512_v26 = vld [vmem:[#allocation11 + $0x68] sm:$0xff] }
  0xc1   :  { %v959_v37 = vadd.f32 %v958_v24, %v945_v35  ;;  %v2250_v24 = vor.u32 %v2491_v21, %v2247_v23  ;;  %v2242_v30 = vor.u32 %v2489_v27, %v2239_v29  ;;  %v2230_v35 = vor.u32 %v2488_v32, %v2229_v31  ;;  %v2514_v23 = vld [vmem:[#allocation11 + $0x78] sm:$0xff]  ;;  %v2513_v25 = vld [vmem:[#allocation11 + $0x70] sm:$0xff]  ;;  %v2503_v27 = vld [vmem:[#allocation11 + $0x20] sm:$0xff] }
  0xc2   :  { %1378 = vmatpush.bf16.msra.mxu1 %v2238_v28  ;;  %v2502_v28 = vld [vmem:[#allocation11 + $0x18] sm:$0xff]  ;;  %v2511_v29 = vld [vmem:[#allocation11 + $0x60] sm:$0xff]  ;;  %v2500_v32 = vld [vmem:[#allocation11 + $0x8] sm:$0xff] }
  0xc3   :  { %1405 = vmatpush.bf16.msra.mxu3 %v2250_v24  ;;  %v2505_v24 = vld [vmem:[#allocation11 + $0x30] sm:$0xff]  ;;  %v2510_v31 = vld [vmem:[#allocation11 + $0x58] sm:$0xff] }
  0xc4   :  { %1555 = vmatpush.bf16.msrb.mxu0 %v2505_v24 }
  0xc6   :  { %v946_v36 = vpop.f32.mrf.mxu2  ;;  %1379 = vmatpush.bf16.msra.mxu1 %v2230_v35  ;;  %v2508_v35 = vld [vmem:[#allocation11 + $0x48] sm:$0xff] }
  0xc7   :  { %v960_v38 = vpop.f32.mrf.mxu3  ;;  %v947_v46 = vadd.f32 %v946_v36, %v933_v40  ;;  %1406 = vmatpush.bf16.msra.mxu3 %v2242_v30  ;;  %v2231_v36 = vld [vmem:[#allocation9 + $0xa8] sm:$0xf0]  ;;  %v2221_v40 = vld [vmem:[#allocation9 + $0x90] sm:$0xf] }
  0xc8   :  { %v2501_v30 = vld [vmem:[#allocation11 + $0x10] sm:$0xff] }
  0xc9   :  { %v961_v49 = vadd.f32 %v960_v38, %v947_v46  ;;  %v2223_v46 = vld [vmem:[#allocation9 + $0x98] sm:$0xf0] }
  0xd6   :  { %v972_v41 = vpop.f32.mrf.mxu0 }
  0xd7   :  { %v986_v42 = vpop.f32.mrf.mxu1  ;;  %v973_v45 = vadd.f32 %v972_v41, %v959_v37  ;;  %v2234_v37 = vor.u32 %v2487_v33, %v2231_v36  ;;  %v2486_v41 = vld [vmem:[#allocation9 + $0x94] sm:$0xf0]  ;;  %v2509_v33 = vld [vmem:[#allocation11 + $0x50] sm:$0xff]  ;;  %v2507_v36 = vld [vmem:[#allocation11 + $0x40] sm:$0xff] }
  0xd9   :  { %v987_v48 = vadd.f32 %v986_v42, %v973_v45  ;;  %1407 = vmatpush.bf16.msra.mxu3 %v2234_v37  ;;  %v2485_v42 = vld [vmem:[#allocation9 + $0x94] sm:$0xf]  ;;  %v2222_v45 = vor.u32 %v2486_v41, %v2221_v40 }
  0xdb   :  { %1380 = vmatpush.bf16.msra.mxu1 %v2222_v45 }
  0xde   :  { %v1000_v1 = vpop.f32.mrf.mxu2  ;;  %v974_v50 = vpop.f32.mrf.mxu0 }
  0xdf   :  { %v1014_v51 = vpop.f32.mrf.mxu3  ;;  %v1001_v17 = vadd.f32 %v1000_v1, %v987_v48  ;;  %v975_v52 = vadd.f32 %v974_v50, %v961_v49  ;;  %v988_v58 = vpop.f32.mrf.mxu1  ;;  %v2226_v48 = vor.u32 %v2485_v42, %v2223_v46  ;;  %v2213_v49 = vld [vmem:[#allocation9 + $0x80] sm:$0xf]  ;;  %v2484_v50 = vld [vmem:[#allocation9 + $0x84] sm:$0xf0] }
  0xe1   :  { %v1015_v54 = vadd.f32 %v1014_v51, %v1001_v17  ;;  %v989_v39 = vadd.f32 %v988_v58, %v975_v52  ;;  %1408 = vmatpush.bf16.msra.mxu3 %v2226_v48  ;;  %v2483_v51 = vld [vmem:[#allocation9 + $0x84] sm:$0xf]  ;;  %v2214_v52 = vor.u32 %v2484_v50, %v2213_v49  ;;  %v2215_v58 = vld [vmem:[#allocation9 + $0x88] sm:$0xf0] }
  0xe3   :  { %v1152_v3 = vadd.f32 %v1148_v10, %v1015_v54  ;;  %v2218_v54 = vor.u32 %v2483_v51, %v2215_v58  ;;  %1381 = vmatpush.bf16.msra.mxu1 %v2214_v52 }
  0xe5   :  { %v1156_v8 = vmax.f32 %v1152_v3, 0.0  ;;  %1409 = vmatpush.bf16.msra.mxu3 %v2218_v54 }
  0xe6   :  { %v1002_v44 = vpop.f32.mrf.mxu2 }
  0xe7   :  { %v1003_v56 = vadd.f32 %v1002_v44, %v989_v39  ;;  %v1016_v57 = vpop.f32.mrf.mxu3  ;;  %1568 = vmatpush.bf16.msrb.mxu1 %v2514_v23 }
  0xe9   :  { %v1017_v4 = vadd.f32 %v1016_v57, %v1003_v56 }
  0xeb   :  { %v1154_v7 = vadd.f32 %v1148_v10, %v1017_v4  ;;  %1569 = vmatpush.bf16.msrb.mxu1 %v2513_v25 }
  0xed   :  { %v1158_v9 = vmax.f32 %v1154_v7, 0.0 }
  0xef   :  { %v1160_v11 = vpack.c.bf16 %v1158_v9, %v1156_v8  ;;  %v1149_v9 = vperm.slane %v2787_v53, 1  ;;  %v2504_v53 = vld [vmem:[#allocation11 + $0x28] sm:$0xff]  ;;  %1570 = vmatpush.bf16.msrb.mxu1 %v2512_v26 }
  0xf0   :  { %1556 = vmatpush.bf16.msrb.mxu0 %v2504_v53 }
  0xf1   :  { %1368 = vmatmul.bf16.vlgmr.msra.gmra.mxu0 %v1160_v11  ;;  %1396 = vmatmul.bf16.vlgmr.msra.gmra.mxu2 %v1160_v11 }
  0xf3   :  { %1571 = vmatpush.bf16.msrb.mxu1 %v2511_v29 }
  0xf4   :  { %1557 = vmatpush.bf16.msrb.mxu0 %v2503_v27 }
  0xf6   :  { %v1028_v34 = vpop.f32.mrf.mxu0 }
  0xf7   :  { %v1042_v38 = vpop.f32.mrf.mxu1  ;;  %1572 = vmatpush.bf16.msrb.mxu1 %v2510_v31 }
  0xf8   :  { %v1043_v39 = vadd.f32 %v1042_v38, %v1028_v34  ;;  %1558 = vmatpush.bf16.msrb.mxu0 %v2502_v28  ;;  %v2499_v34 = vld [vmem:[#allocation11] sm:$0xff]  ;;  %v1194_v38 = vld [vmem:[%s2807_s4] sm:$0x3] }
  0xf9   :  { %v1196_v42 = vperm.slane %v1194_v38, 0 }
  0xfb   :  { %1573 = vmatpush.bf16.msrb.mxu1 %v2509_v33 }
  0xfc   :  { %1559 = vmatpush.bf16.msrb.mxu0 %v2501_v30 }
  0xfe   :  { %v1056_v1 = vpop.f32.mrf.mxu2  ;;  %v1030_v10 = vpop.f32.mrf.mxu0 }
  0xff   :  { %v1070_v17 = vpop.f32.mrf.mxu3  ;;  %v1044_v44 = vpop.f32.mrf.mxu1  ;;  %v1057_v43 = vadd.f32 %v1056_v1, %v1043_v39  ;;  %1574 = vmatpush.bf16.msrb.mxu1 %v2508_v35  ;;  %v1197_v1 = vperm.slane %v1194_v38, 1 }
 0x100   :  { %v1045_v47 = vadd.f32 %v1044_v44, %v1030_v10  ;;  %1560 = vmatpush.bf16.msrb.mxu0 %v2500_v32 }
 0x101   :  { %v1071_v59 = vadd.f32 %v1070_v17, %v1057_v43 }
 0x103   :  { %1575 = vmatpush.bf16.msrb.mxu1 %v2507_v36 }
 0x104   :  { %1561 = vmatpush.bf16.msrb.mxu0 %v2499_v34 }
 0x106   :  { %v1058_v55 = vpop.f32.mrf.mxu2 }
 0x107   :  { %v1072_v56 = vpop.f32.mrf.mxu3  ;;  %v1059_v61 = vadd.f32 %v1058_v55, %v1045_v47 }
 0x109   :  { %v1073_v0 = vadd.f32 %v1072_v56, %v1059_v61  ;;  %v2526_v61 = vld [vmem:[%s2809_s6] ss:$0 sm:$0xff]  ;;  %s2693_s6 = smov [#allocation12]  }
 0x10a   :  { %s1618_s29 = sshll.u32 %s2693_s6, 4  ;;  %s1619_s29 = int_to_ptr.vmem [resolvable:$true] %s1618_s29 }
 0x116   :  { %v1084_v57 = vpop.f32.mrf.mxu0 }
 0x117   :  { %v1098_v60 = vpop.f32.mrf.mxu1  ;;  %v1085_v62 = vadd.f32 %v1084_v57, %v1071_v59 }
 0x119   :  { %v1099_v2 = vadd.f32 %v1098_v60, %v1085_v62 }
 0x11e   :  { %v1112_v63 = vpop.f32.mrf.mxu2  ;;  %v1086_v4 = vpop.f32.mrf.mxu0 }
 0x11f   :  { %v1126_v3 = vpop.f32.mrf.mxu3  ;;  %v1113_v5 = vadd.f32 %v1112_v63, %v1099_v2  ;;  %v1087_v6 = vadd.f32 %v1086_v4, %v1073_v0  ;;  %v1100_v7 = vpop.f32.mrf.mxu1 }
 0x121   :  { %v1127_v8 = vadd.f32 %v1126_v3, %v1113_v5  ;;  %v1101_v11 = vadd.f32 %v1100_v7, %v1087_v6 }
 0x123   :  { %v1153_v15 = vadd.f32 %v1149_v9, %v1127_v8 }
 0x125   :  { %v1157_v19 = vmax.f32 %v1153_v15, 0.0 }
 0x126   :  { %v1114_v12 = vpop.f32.mrf.mxu2 }
 0x127   :  { %v1115_v13 = vadd.f32 %v1114_v12, %v1101_v11  ;;  %v1128_v14 = vpop.f32.mrf.mxu3 }
 0x129   :  { %v1129_v16 = vadd.f32 %v1128_v14, %v1115_v13 }
 0x12b   :  { %v1155_v18 = vadd.f32 %v1149_v9, %v1129_v16 }
 0x12d   :  { %v1159_v20 = vmax.f32 %v1155_v18, 0.0 }
 0x12f   :  { %v1161_v21 = vpack.c.bf16 %v1159_v20, %v1157_v19 }
 0x131   :  { %1382 = vmatmul.bf16.vlgmr.msra.gmra.mxu1 %v1161_v21  ;;  %1410 = vmatmul.bf16.vlgmr.msra.gmra.mxu3 %v1161_v21 }
 0x16e   :  { %v1369_v37 = vpop.f32.mrf.mxu0 }
 0x16f   :  { %v1370_v46 = vadd.f32 %v1369_v37, %v1196_v42 }
 0x174   :  { %v1397_v40 = vpop.f32.mrf.mxu2 }
 0x175   :  { %v1398_v58 = vadd.f32 %v1397_v40, %v1197_v1 }
 0x176   :  { %v1371_v45 = vpop.f32.mrf.mxu0 }
 0x177   :  { %v1372_v49 = vadd.f32 %v1371_v45, %v1196_v42 }
 0x17c   :  { %v1399_v52 = vpop.f32.mrf.mxu2 }
 0x17d   :  { %v1400_v39 = vadd.f32 %v1399_v52, %v1197_v1 }
 0x1ae   :  { %v1383_v41 = vpop.f32.mrf.mxu1 }
 0x1af   :  { %v1384_v50 = vadd.f32 %v1383_v41, %v1370_v46 }
 0x1b1   :  { %v1416_v54 = vmax.f32 %v1384_v50, 0.0 }
 0x1b4   :  { %v1411_v48 = vpop.f32.mrf.mxu3 }
 0x1b5   :  { %v1412_v44 = vadd.f32 %v1411_v48, %v1398_v58 }
 0x1b6   :  { %v1385_v51 = vpop.f32.mrf.mxu1 }
 0x1b7   :  { %v1386_v17 = vadd.f32 %v1385_v51, %v1372_v49  ;;  %v1417_v56 = vmax.f32 %v1412_v44, 0.0 }
 0x1b9   :  { %v1418_v10 = vmax.f32 %v1386_v17, 0.0 }
 0x1bb   :  { %v1420_v43 = vpack.c.bf16 %v1418_v10, %v1416_v54 }
 0x1bc   :  { %v1413_v55 = vpop.f32.mrf.mxu3 }
 0x1bd   :  { %v1414_v47 = vadd.f32 %v1413_v55, %v1400_v39  ;;  %1562 = vmatmul.bf16.vlgmr.msrb.gmra.mxu0 %v1420_v43 }
 0x1bf   :  { %v1419_v57 = vmax.f32 %v1414_v47, 0.0 }
 0x1c1   :  { %v1421_v59 = vpack.c.bf16 %v1419_v57, %v1417_v56 }
 0x1c3   :  { %1576 = vmatmul.bf16.vlgmr.msrb.gmra.mxu1 %v1421_v59 }
 0x23a   :  { %v1563_v60 = vpop.f32.mrf.mxu0 }
 0x23b   :  { %v1564_v62 = vadd.f32 %v2526_v61, %v1563_v60 }
 0x240   :  { %v1577_v63 = vpop.f32.mrf.mxu1 }
 0x241   :  { %v1578_v0 = vadd.f32 %v1577_v63, %v1564_v62 }
 0x242   :  { %v1565_v3 = vpop.f32.mrf.mxu0 }
 0x243   :  { %v1582_v2 = vmul.f32 %v1578_v0, %v1578_v0  ;;  %v1566_v4 = vadd.f32 %v2526_v61, %v1565_v3 }
 0x245   :  { %1584 = vadd.xlane.f32.xlu0 %v1582_v2 }
 0x248   :  { %v1579_v5 = vpop.f32.mrf.mxu1 }
 0x249   :  { %v1580_v6 = vadd.f32 %v1579_v5, %v1566_v4 }
 0x24b   :  { %v1583_v7 = vmul.f32 %v1580_v6, %v1580_v6 }
 0x24d   :  { %1586 = vadd.xlane.f32.xlu0 %v1583_v7 }
 0x2b8   :  { %v1585_v8 = vpop.xlane.xlu0 %1584 }
 0x2b9   :  { %v1588_v9 = vmax.f32 %v1585_v8, 1e-24 }
 0x2bb   :  { %2527 = vrsqrt.f32 %v1588_v9  ;;  %vm1596_vm1 = vweird.f32 %v1588_v9 }
 0x2c0   :  { %v1587_v11 = vpop.xlane.xlu0 %1586 }
 0x2c1   :  { %v2528_v12 = vpop.eup %2527  ;;  %v1589_v13 = vmax.f32 %v1587_v11, 1e-24 }
 0x2c2   :  { %v1591_v14 = vmul.f32 %v2528_v12, %v1588_v9  ;;  %vm1597_vm0 = vweird.f32 %v2528_v12 }
 0x2c3   :  { %2529 = vrsqrt.f32 %v1589_v13  ;;  %vm1598_vm2 = vmor %vm1596_vm1, %vm1597_vm0  ;;  %vm1606_vm4 = vweird.f32 %v1589_v13 }
 0x2c4   :  { %v1592_v15 = vmul.f32 %v2528_v12, %v1591_v14 }
 0x2c6   :  { %v1593_v16 = vmul.f32 0.5, %v1592_v15 }
 0x2c8   :  { %v1594_v18 = vsub.f32 1.5, %v1593_v16 }
 0x2c9   :  { %v2530_v19 = vpop.eup %2529 }
 0x2ca   :  { %v1595_v20 = vmul.f32 %v2528_v12, %v1594_v18  ;;  %v1601_v21 = vmul.f32 %v2530_v19, %v1589_v13  ;;  %vm1607_vm3 = vweird.f32 %v2530_v19 }
 0x2cb   :  { %vm1608_vm5 = vmor %vm1606_vm4, %vm1607_vm3 }
 0x2cc   :  { %v1599_v22 = vsel %vm1598_vm2, %v2528_v12, %v1595_v20  ;;  %v1602_v23 = vmul.f32 %v2530_v19, %v1601_v21 }
 0x2cd   :  { %v1610_v24 = vmul.f32 %v1599_v22, %v1578_v0 }
 0x2ce   :  { %v1603_v25 = vmul.f32 0.5, %v1602_v23 }
 0x2cf   :  { %1612 = vst [vmem:[#allocation12] sm:$0xff] %v1610_v24 }
 0x2d0   :  { %v1604_v53 = vsub.f32 1.5, %v1603_v25 }
 0x2d2   :  { %v1605_v26 = vmul.f32 %v2530_v19, %v1604_v53 }
 0x2d4   :  { %v1609_v27 = vsel %vm1608_vm5, %v2530_v19, %v1605_v26 }
 0x2d5   :  { %v1611_v28 = vmul.f32 %v1609_v27, %v1580_v6 }
 0x2d7   :  { %1613 = vst [vmem:[#allocation12 + $0x8] sm:$0xff] %v1611_v28 }
 0x2d8   :  { %1626 = dma.vmem_to_hbm [thread:$0]  %s1619_s29, 256, %s1621_s11, [#allocation5], %s2684_s9, %s2684_s9, %s2685_s10  }
 0x2d9   :  { %2681 = dma.done.wait [#allocation5], 256  }
 0x2da   :  { %2682 = vsyncadd [#allocation5], 4294967040 }
 0x2db   :  { %1631 = vsyncpa [#allocation4], 1 }
 0x2dc   :  { %1632 = vsyncpa [#allocation7], 1 }
 0x2dd   :  { %1633 = vsyncpa [#allocation10], 1 }
 0x2de   :  { %1634 = vsyncpa [#allocation5], 1 }

</bundles_post_ra>
